<compile_context>
chip_gen: v7x
topology: tpu7x:2x2x1
jax: 0.10.0
libtpu: 0.0.40
codegen_flags: <defaults>
</compile_context>

<pallas_src>
import functools
import math

import jax
import jax.numpy as jnp
from jax.experimental import pallas as pl
from jax.experimental.pallas import tpu as pltpu


def _layernorm_1pass(x, gamma, beta, eps=1e-6):
    # One-pass statistics: var = E[x^2] - mu^2 -> two independent lane reductions
    # instead of the serialized mean -> centered-mean chain.  Clamp var >= 0 to
    # guard against cancellation for pathological inputs.
    mu = jnp.mean(x, axis=-1, keepdims=True)
    ex2 = jnp.mean(x * x, axis=-1, keepdims=True)
    var = jnp.maximum(ex2 - mu * mu, 0.0)
    return (x - mu) * jax.lax.rsqrt(var + eps) * gamma + beta


def enc_layer_kernel(
    xq_ref, xkv_ref, mask_ref,
    wq_ref, bq_ref, wkv_ref, bkv_ref, wo_ref, bo_ref,
    g1_ref, beta1_ref,
    w1_ref, b1_ref, w2_ref, b2_ref,
    g2_ref, beta2_ref,
    out_ref,
    kv_scratch,
    *, num_head, approx_recip,
):
    f32 = jnp.float32
    xq = xq_ref[0]                         # (TQ, D) query tile, compute dtype
    cdt = xq.dtype
    TQ, D = xq.shape
    dh = D // num_head
    S = kv_scratch.shape[0]

    # --- K/V projections: query-tile invariant.  Compute once per batch row
    # (first query tile of this row) with ONE wide matmul (N = 2D) into VMEM
    # scratch; reuse for the remaining query tiles (qt axis is "arbitrary").
    @pl.when(pl.program_id(1) == 0)
    def _():
        kv = jnp.dot(xkv_ref[0], wkv_ref[...],
                     preferred_element_type=f32) + bkv_ref[...]          # (S, 2D)
        kv_scratch[...] = kv.astype(kv_scratch.dtype)

    kv_all = kv_scratch[...]               # (S, 2D), compute dtype

    # Key-padding mask bias: broadcast once, OUTSIDE the head loop (no CSE of
    # broadcast_in_dim).  NOTE: a fully-masked key row would give uniform attention;
    # padding masks never do that.
    neg_bias = jnp.broadcast_to(mask_ref[0] * (-1e9), (TQ, S))           # (TQ, S) f32

    # --- Q projection: ONE wide matmul (N = D).  1/sqrt(dh) folded into wq/bq.
    q_all = jnp.dot(xq, wq_ref[...], preferred_element_type=f32) + bq_ref[...]   # (TQ, D)

    # --- Per-head attention (static small loop; per-head q/k/v are static lane slices).
    o_parts = []
    for h in range(num_head):
        qh = q_all[:, h * dh:(h + 1) * dh].astype(cdt)                   # (TQ, dh)
        kh = kv_all[:, h * dh:(h + 1) * dh]                              # (S, dh)
        vh = kv_all[:, D + h * dh: D + (h + 1) * dh]                     # (S, dh)

        # scores = qh @ kh.T without materializing a transpose (contract last dims).
        s = jax.lax.dot_general(qh, kh, (((1,), (1,)), ((), ())),
                                preferred_element_type=f32)              # (TQ, S)
        s = s + neg_bias

        m = jnp.max(s, axis=-1, keepdims=True)
        e = jnp.exp(s - m)
        denom = jnp.sum(e, axis=-1, keepdims=True)
        if approx_recip:
            p = e * pl.reciprocal(denom, approx=True)                    # EUP slot
        else:
            p = e / denom

        o_parts.append(jnp.dot(p.astype(cdt), vh, preferred_element_type=f32))   # (TQ, dh)

    # --- Fused output projection: one (TQ,D)@(D,D) matmul with K=D instead of
    # H matmuls with K=dh plus H accumulator adds.
    o_cat = jnp.concatenate(o_parts, axis=-1).astype(cdt)                # (TQ, D)
    attn_out = jnp.dot(o_cat, wo_ref[...], preferred_element_type=f32) + bo_ref[...]

    # dropout1 -> identity (inference)
    out1 = _layernorm_1pass(xq.astype(f32) + attn_out, g1_ref[...], beta1_ref[...])

    # --- Feed-forward block ---------------------------------------------------
    h1 = jnp.maximum(
        jnp.dot(out1.astype(cdt), w1_ref[...], preferred_element_type=f32) + b1_ref[...],
        0.0)
    ffn_out = jnp.dot(h1.astype(cdt), w2_ref[...], preferred_element_type=f32) + b2_ref[...]

    # dropout2 -> identity (inference)
    out2 = _layernorm_1pass(out1 + ffn_out, g2_ref[...], beta2_ref[...])

    out_ref[0] = out2.astype(out_ref.dtype)


def _pick_query_tile(S):
    # Largest tile <= 256 dividing S: bounds per-step VMEM ((TQ,S) scores,
    # (TQ, D/I) activations) while keeping blocks sublane-friendly.
    for tq in (256, 128, 64, 32, 16, 8):
        if S % tq == 0:
            return tq
    return S


def _vmem_limit_bytes(resident_bytes):
    # Generation-aware ceiling: v7x has 64 MiB VMEM per TensorCore, v5e/v6e 128 MiB.
    try:
        kind = jax.devices()[0].device_kind.lower()
    except Exception:  # pragma: no cover - defensive
        kind = ""
    ceiling = (56 << 20) if "7" in kind else (100 << 20)
    want = int(resident_bytes * 1.25) + (4 << 20)
    return int(min(ceiling, max(32 << 20, want)))


def transformer_enc_layer(x, mask, params, num_head, compute_dtype=None,
                          approx_recip=True):
    """x: (B, S, D); mask: (B, 1, S) key-padding mask (1 = masked key position)."""
    B, S, D = x.shape
    I = params["w1"].shape[1]
    H = num_head
    assert D % H == 0, "d_model must be divisible by num_head"
    dh = D // H
    if D >= 128:
        # Lane-dense stores and full MXU width need D % 128 == 0 for real configs.
        assert D % 128 == 0, "d_model must be a multiple of 128 for real configs"
    scale = 1.0 / math.sqrt(dh)
    f32 = jnp.float32
    cdt = jnp.dtype(x.dtype) if compute_dtype is None else jnp.dtype(compute_dtype)

    TQ = _pick_query_tile(S)
    n_qt = S // TQ

    # --- One-time (XLA-side) weight packing -----------------------------------
    wq = (params["wq"] * scale).astype(cdt)                               # (D, D)
    bq = (params["bq"] * scale).reshape(1, D).astype(f32)
    wkv = jnp.concatenate([params["wk"], params["wv"]], axis=1).astype(cdt)   # (D, 2D)
    bkv = jnp.concatenate([params["bk"], params["bv"]], axis=1).reshape(1, 2 * D).astype(f32)
    wo = params["wo"].astype(cdt)                                         # (D, D)
    bo = params["bo"].reshape(1, D).astype(f32)
    w1 = params["w1"].astype(cdt)
    b1 = params["b1"].reshape(1, I).astype(f32)
    w2 = params["w2"].astype(cdt)
    b2 = params["b2"].reshape(1, D).astype(f32)
    g1 = params["g1"].reshape(1, D).astype(f32)
    be1 = params["beta1"].reshape(1, D).astype(f32)
    g2 = params["g2"].reshape(1, D).astype(f32)
    be2 = params["beta2"].reshape(1, D).astype(f32)

    x_c = x.astype(cdt)
    mask_f = mask.astype(f32)

    kernel = functools.partial(enc_layer_kernel, num_head=H, approx_recip=approx_recip)

    # --- VMEM budget (weights single-buffered, activations double-buffered,
    #     plus K/V scratch and rough in-kernel temporaries) ----------------------
    cb = jnp.dtype(cdt).itemsize
    weight_bytes = (D * D + D * 2 * D + D * D + D * I + I * D) * cb \
        + (D + 2 * D + D + I + 5 * D) * 4
    act_bytes = 2 * ((TQ * D + S * D + TQ * D) * cb + S * 4)
    scratch_bytes = S * 2 * D * cb
    temp_bytes = 4 * (TQ * S + 4 * TQ * D + TQ * I + S * 2 * D)
    vmem_limit = _vmem_limit_bytes(weight_bytes + act_bytes + scratch_bytes + temp_bytes)

    # Advisory cost estimate for the XLA scheduler.
    flops = int(2 * B * S * D * (4 * D + 2 * S + 2 * I))
    transcendentals = int(B * H * S * S)
    bytes_accessed = int(cb * (2 * B * S * D + 4 * D * D + 2 * D * I)
                         + 4 * (B * S + 10 * D + I))

    def build(single_buffer_weights):
        def const_spec(shape):
            n = len(shape)
            if single_buffer_weights:
                # Grid-invariant blocks: a second pipeline buffer is pure VMEM waste.
                return pl.BlockSpec(shape, lambda b, q, _n=n: (0,) * _n,
                                    pipeline_mode=pl.Buffered(1))
            return pl.BlockSpec(shape, lambda b, q, _n=n: (0,) * _n)

        in_specs = [
            pl.BlockSpec((1, TQ, D), lambda b, q: (b, q, 0)),   # x (query tile / residual)
            pl.BlockSpec((1, S, D), lambda b, q: (b, 0, 0)),    # x (full row, K/V source)
            pl.BlockSpec((1, 1, S), lambda b, q: (b, 0, 0)),    # key-padding mask
            const_spec((D, D)), const_spec((1, D)),             # wq (scaled), bq (scaled)
            const_spec((D, 2 * D)), const_spec((1, 2 * D)),     # packed wk|wv, bk|bv
            const_spec((D, D)), const_spec((1, D)),             # wo, bo
            const_spec((1, D)), const_spec((1, D)),             # ln1 gamma, beta
            const_spec((D, I)), const_spec((1, I)),             # ffn w1, b1
            const_spec((I, D)), const_spec((1, D)),             # ffn w2, b2
            const_spec((1, D)), const_spec((1, D)),             # ln2 gamma, beta
        ]

        return pl.pallas_call(
            kernel,
            out_shape=jax.ShapeDtypeStruct((B, S, D), x.dtype),
            grid_spec=pltpu.PrefetchScalarGridSpec(
                num_scalar_prefetch=0,
                # Batch axis is "parallel" (keeps both v7x TensorCores busy for B>=2);
                # query-tile axis is "arbitrary" because the K/V scratch is filled at
                # qt==0 and reused by the remaining tiles of the same batch row.
                grid=(B, n_qt),
                in_specs=in_specs,
                out_specs=pl.BlockSpec((1, TQ, D), lambda b, q: (b, q, 0)),
                scratch_shapes=[pltpu.VMEM((S, 2 * D), cdt)],   # projected K|V cache
            ),
            compiler_params=pltpu.CompilerParams(
                dimension_semantics=("parallel", "arbitrary"),
                vmem_limit_bytes=vmem_limit,
            ),
            cost_estimate=pl.CostEstimate(
                flops=flops, transcendentals=transcendentals,
                bytes_accessed=bytes_accessed),
        )

    args = (x_c, x_c, mask_f,
            wq, bq, wkv, bkv, wo, bo,
            g1, be1, w1, b1, w2, b2, g2, be2)

    try:
        out = build(True)(*args)
        return jax.block_until_ready(out)
    except Exception:
        # pipeline_mode=pl.Buffered(1) not supported on this jax version/backend:
        # fall back to default double-buffered weight blocks (same math).
        return build(False)(*args)


# ------------------------------- reference ----------------------------------
def _layernorm_ref(x, gamma, beta, eps=1e-6):
    mu = jnp.mean(x, axis=-1, keepdims=True)
    var = jnp.mean((x - mu) ** 2, axis=-1, keepdims=True)
    return (x - mu) * jax.lax.rsqrt(var + eps) * gamma + beta


def reference_enc_layer(x, mask, params, num_head):
    B, S, D = x.shape
    dh = D // num_head
    q = x @ params["wq"] + params["bq"][0]
    k = x @ params["wk"] + params["bk"][0]
    v = x @ params["wv"] + params["bv"][0]

    def split(t):
        return t.reshape(B, S, num_head, dh).transpose(0, 2, 1, 3)   # (B,H,S,dh)

    qh, kh, vh = split(q), split(k), split(v)
    scores = jnp.einsum("bhqd,bhkd->bhqk", qh, kh) / math.sqrt(dh)
    scores = scores + mask[:, None, :, :] * (-1e9)                   # (B,1,1,S) broadcast
    p = jax.nn.softmax(scores, axis=-1)
    o = jnp.einsum("bhqk,bhkd->bhqd", p, vh)
    concat = o.transpose(0, 2, 1, 3).reshape(B, S, D)
    attn_out = concat @ params["wo"] + params["bo"][0]
    out1 = _layernorm_ref(x + attn_out, params["g1"][0], params["beta1"][0])
    h1 = jax.nn.relu(out1 @ params["w1"] + params["b1"][0])
    ffn_out = h1 @ params["w2"] + params["b2"][0]
    out2 = _layernorm_ref(out1 + ffn_out, params["g2"][0], params["beta2"][0])
    return out2


if __name__ == "__main__":
    B, S, D, H, I = 2, 8, 32, 4, 64    # batch, seq, d_model, num_head, intermediate

    key = jax.random.PRNGKey(0)
    keys = jax.random.split(key, 14)

    def init(k, shape, scale=0.1):
        return jax.random.normal(k, shape, dtype=jnp.float32) * scale

    params = {
        "wq": init(keys[0], (D, D)), "bq": init(keys[1], (1, D)),
        "wk": init(keys[2], (D, D)), "bk": init(keys[3], (1, D)),
        "wv": init(keys[4], (D, D)), "bv": init(keys[5], (1, D)),
        "wo": init(keys[6], (D, D)), "bo": init(keys[7], (1, D)),
        "g1": jnp.ones((1, D), jnp.float32), "beta1": jnp.zeros((1, D), jnp.float32),
        "w1": init(keys[8], (D, I)), "b1": init(keys[9], (1, I)),
        "w2": init(keys[10], (I, D)), "b2": init(keys[11], (1, D)),
        "g2": jnp.ones((1, D), jnp.float32), "beta2": jnp.zeros((1, D), jnp.float32),
    }

    x = jax.random.normal(keys[12], (B, S, D), dtype=jnp.float32)
    # Key-padding mask: last 2 key positions of batch 1 are masked.
    mask = jnp.zeros((B, 1, S), dtype=jnp.float32)
    mask = mask.at[1, 0, -2:].set(1.0)

    out = transformer_enc_layer(x, mask, params, num_head=H)
    out = jax.block_until_ready(out)

    ref = reference_enc_layer(x, mask, params, num_head=H)
    assert out.shape == (B, S, D)
    # approx reciprocal (EUP) in the softmax -> slightly looser than exact-f32 tolerance
    assert jnp.allclose(out, ref, atol=2e-3, rtol=2e-3), "f32 mismatch vs reference"

    # bf16 matmul path (f32 accumulation; softmax / LayerNorm / residuals stay f32).
    out_bf16 = transformer_enc_layer(x, mask, params, num_head=H,
                                     compute_dtype=jnp.bfloat16)
    out_bf16 = jax.block_until_ready(out_bf16)
    assert out_bf16.shape == (B, S, D)
    assert jnp.allclose(out_bf16, ref, atol=1e-1, rtol=1e-1), "bf16 mismatch vs reference"

    # NOTE: dropout1/dropout2 are identity here (inference semantics).
    print("KERNEL_OK")
</pallas_src>

<mosaic_0001>
module attributes {stable_mosaic.version = 11 : i64} {
  func.func @enc_layer_kernel(%arg0: i32, %arg1: i32, %arg2: memref<1x8x32xf32, #tpu.memory_space<vmem>>, %arg3: memref<1x8x32xf32, #tpu.memory_space<vmem>>, %arg4: memref<1x1x8xf32, #tpu.memory_space<vmem>>, %arg5: memref<32x32xf32, #tpu.memory_space<vmem>>, %arg6: memref<1x32xf32, #tpu.memory_space<vmem>>, %arg7: memref<32x64xf32, #tpu.memory_space<vmem>>, %arg8: memref<1x64xf32, #tpu.memory_space<vmem>>, %arg9: memref<32x32xf32, #tpu.memory_space<vmem>>, %arg10: memref<1x32xf32, #tpu.memory_space<vmem>>, %arg11: memref<1x32xf32, #tpu.memory_space<vmem>>, %arg12: memref<1x32xf32, #tpu.memory_space<vmem>>, %arg13: memref<32x64xf32, #tpu.memory_space<vmem>>, %arg14: memref<1x64xf32, #tpu.memory_space<vmem>>, %arg15: memref<64x32xf32, #tpu.memory_space<vmem>>, %arg16: memref<1x32xf32, #tpu.memory_space<vmem>>, %arg17: memref<1x32xf32, #tpu.memory_space<vmem>>, %arg18: memref<1x32xf32, #tpu.memory_space<vmem>>, %arg19: memref<1x8x32xf32, #tpu.memory_space<vmem>>, %arg20: memref<8x64xf32, #tpu.memory_space<vmem>>) attributes {dimension_semantics = [#tpu.dimension_semantics<parallel>, #tpu.dimension_semantics<arbitrary>], iteration_bounds = array<i64: 2, 1>, scalar_prefetch = 0 : i64, scratch_operands = 1 : i64, tpu.core_type = #tpu.core_type<tc>, window_params = [{transform_indices = @transform_0, window_bounds = array<i64: 1, 8, 32>}, {transform_indices = @transform_1, window_bounds = array<i64: 1, 8, 32>}, {transform_indices = @transform_2, window_bounds = array<i64: 1, 1, 8>}, {pipeline_mode = #tpu.pipeline_mode<synchronous>, transform_indices = @transform_3, window_bounds = array<i64: 32, 32>}, {pipeline_mode = #tpu.pipeline_mode<synchronous>, transform_indices = @transform_4, window_bounds = array<i64: 1, 32>}, {pipeline_mode = #tpu.pipeline_mode<synchronous>, transform_indices = @transform_5, window_bounds = array<i64: 32, 64>}, {pipeline_mode = #tpu.pipeline_mode<synchronous>, transform_indices = @transform_6, window_bounds = array<i64: 1, 64>}, {pipeline_mode = #tpu.pipeline_mode<synchronous>, transform_indices = @transform_7, window_bounds = array<i64: 32, 32>}, {pipeline_mode = #tpu.pipeline_mode<synchronous>, transform_indices = @transform_8, window_bounds = array<i64: 1, 32>}, {pipeline_mode = #tpu.pipeline_mode<synchronous>, transform_indices = @transform_9, window_bounds = array<i64: 1, 32>}, {pipeline_mode = #tpu.pipeline_mode<synchronous>, transform_indices = @transform_10, window_bounds = array<i64: 1, 32>}, {pipeline_mode = #tpu.pipeline_mode<synchronous>, transform_indices = @transform_11, window_bounds = array<i64: 32, 64>}, {pipeline_mode = #tpu.pipeline_mode<synchronous>, transform_indices = @transform_12, window_bounds = array<i64: 1, 64>}, {pipeline_mode = #tpu.pipeline_mode<synchronous>, transform_indices = @transform_13, window_bounds = array<i64: 64, 32>}, {pipeline_mode = #tpu.pipeline_mode<synchronous>, transform_indices = @transform_14, window_bounds = array<i64: 1, 32>}, {pipeline_mode = #tpu.pipeline_mode<synchronous>, transform_indices = @transform_15, window_bounds = array<i64: 1, 32>}, {pipeline_mode = #tpu.pipeline_mode<synchronous>, transform_indices = @transform_16, window_bounds = array<i64: 1, 32>}, {transform_indices = @transform_17, window_bounds = array<i64: 1, 8, 32>}]} {
    %c0 = arith.constant 0 : index
    %c0_0 = arith.constant 0 : index
    %c0_1 = arith.constant 0 : index
    %0 = vector.load %arg2[%c0, %c0_0, %c0_1] : memref<1x8x32xf32, #tpu.memory_space<vmem>>, vector<1x8x32xf32>
    %1 = vector.shape_cast %0 : vector<1x8x32xf32> to vector<8x32xf32>
    %c0_i32 = arith.constant 0 : i32
    %2 = arith.cmpi eq, %arg1, %c0_i32 : i32
    %3 = arith.extui %2 : i1 to i32
    %c0_i32_2 = arith.constant 0 : i32
    %4 = arith.cmpi ne, %3, %c0_i32_2 : i32
    scf.if %4 {
      %c0_68 = arith.constant 0 : index
      %c0_69 = arith.constant 0 : index
      %c0_70 = arith.constant 0 : index
      %156 = vector.load %arg3[%c0_68, %c0_69, %c0_70] : memref<1x8x32xf32, #tpu.memory_space<vmem>>, vector<1x8x32xf32>
      %157 = vector.shape_cast %156 : vector<1x8x32xf32> to vector<8x32xf32>
      %c0_71 = arith.constant 0 : index
      %c0_72 = arith.constant 0 : index
      %158 = vector.load %arg7[%c0_71, %c0_72] : memref<32x64xf32, #tpu.memory_space<vmem>>, vector<32x64xf32>
      %cst_73 = arith.constant dense<0.000000e+00> : vector<8x64xf32>
      %159 = tpu.matmul %157, %158, %cst_73 {dimension_numbers = #tpu.dot_dimension_numbers<[1], [0], [0], [1], [0, 0, 1, 1], [], []>} : vector<8x32xf32>, vector<32x64xf32>, vector<8x64xf32> -> vector<8x64xf32>
      %c0_74 = arith.constant 0 : index
      %c0_75 = arith.constant 0 : index
      %160 = vector.load %arg8[%c0_74, %c0_75] : memref<1x64xf32, #tpu.memory_space<vmem>>, vector<1x64xf32>
      %161 = vector.broadcast %160 : vector<1x64xf32> to vector<8x64xf32>
      %162 = arith.addf %159, %161 : vector<8x64xf32>
      %c0_76 = arith.constant 0 : index
      %c0_77 = arith.constant 0 : index
      %163 = vector.load %arg20[%c0_76, %c0_77] : memref<8x64xf32, #tpu.memory_space<vmem>>, vector<8x64xf32>
      tpu.vector_store %arg20[%c0_76, %c0_77], %162 {strides = array<i32>} : memref<8x64xf32, #tpu.memory_space<vmem>>, vector<8x64xf32>,
    } else {
    }
    %c0_3 = arith.constant 0 : index
    %c0_4 = arith.constant 0 : index
    %5 = vector.load %arg20[%c0_3, %c0_4] : memref<8x64xf32, #tpu.memory_space<vmem>>, vector<8x64xf32>
    %c0_5 = arith.constant 0 : index
    %c0_6 = arith.constant 0 : index
    %c0_7 = arith.constant 0 : index
    %6 = vector.load %arg4[%c0_5, %c0_6, %c0_7] : memref<1x1x8xf32, #tpu.memory_space<vmem>>, vector<1x1x8xf32>
    %7 = vector.shape_cast %6 : vector<1x1x8xf32> to vector<1x8xf32>
    %cst = arith.constant -1.000000e+09 : f32
    %8 = vector.broadcast %cst : f32 to vector<1x8xf32>
    %9 = arith.mulf %7, %8 : vector<1x8xf32>
    %10 = vector.shape_cast %9 : vector<1x8xf32> to vector<1x8xf32>
    %11 = vector.broadcast %10 : vector<1x8xf32> to vector<8x8xf32>
    %c0_8 = arith.constant 0 : index
    %c0_9 = arith.constant 0 : index
    %12 = vector.load %arg5[%c0_8, %c0_9] : memref<32x32xf32, #tpu.memory_space<vmem>>, vector<32x32xf32>
    %cst_10 = arith.constant dense<0.000000e+00> : vector<8x32xf32>
    %13 = tpu.matmul %1, %12, %cst_10 {dimension_numbers = #tpu.dot_dimension_numbers<[1], [0], [0], [1], [0, 0, 1, 1], [], []>} : vector<8x32xf32>, vector<32x32xf32>, vector<8x32xf32> -> vector<8x32xf32>
    %c0_11 = arith.constant 0 : index
    %c0_12 = arith.constant 0 : index
    %14 = vector.load %arg6[%c0_11, %c0_12] : memref<1x32xf32, #tpu.memory_space<vmem>>, vector<1x32xf32>
    %15 = vector.broadcast %14 : vector<1x32xf32> to vector<8x32xf32>
    %16 = arith.addf %13, %15 : vector<8x32xf32>
    %17 = vector.extract_strided_slice %16 {offsets = [0, 0], sizes = [8, 8], strides = [1, 1]} : vector<8x32xf32> to vector<8x8xf32>
    %18 = vector.extract_strided_slice %5 {offsets = [0, 0], sizes = [8, 8], strides = [1, 1]} : vector<8x64xf32> to vector<8x8xf32>
    %19 = vector.extract_strided_slice %5 {offsets = [0, 32], sizes = [8, 8], strides = [1, 1]} : vector<8x64xf32> to vector<8x8xf32>
    %cst_13 = arith.constant dense<0.000000e+00> : vector<8x8xf32>
    %20 = tpu.matmul %17, %18, %cst_13 {dimension_numbers = #tpu.dot_dimension_numbers<[1], [1], [0], [0], [0, 0, 1, 0], [], []>} : vector<8x8xf32>, vector<8x8xf32>, vector<8x8xf32> -> vector<8x8xf32>
    %21 = arith.addf %20, %11 : vector<8x8xf32>
    %cst_14 = arith.constant dense<0xFF800000> : vector<8xf32>
    %22 = vector.multi_reduction <maximumf>, %21, %cst_14 [1] : vector<8x8xf32> to vector<8xf32>
    %23 = vector.shape_cast %22 : vector<8xf32> to vector<8x1xf32>
    %24 = vector.broadcast %23 : vector<8x1xf32> to vector<8x8xf32>
    %25 = arith.subf %21, %24 : vector<8x8xf32>
    %26 = math.exp %25 : vector<8x8xf32>
    %cst_15 = arith.constant dense<0.000000e+00> : vector<8xf32>
    %27 = vector.multi_reduction <add>, %26, %cst_15 [1] : vector<8x8xf32> to vector<8xf32>
    %28 = vector.shape_cast %27 : vector<8xf32> to vector<8x1xf32>
    %29 = tpu.reciprocal %28 {approx = true} : vector<8x1xf32> -> vector<8x1xf32>
    %30 = vector.broadcast %29 : vector<8x1xf32> to vector<8x8xf32>
    %31 = arith.mulf %26, %30 : vector<8x8xf32>
    %cst_16 = arith.constant dense<0.000000e+00> : vector<8x8xf32>
    %32 = tpu.matmul %31, %19, %cst_16 {dimension_numbers = #tpu.dot_dimension_numbers<[1], [0], [0], [1], [0, 0, 1, 1], [], []>} : vector<8x8xf32>, vector<8x8xf32>, vector<8x8xf32> -> vector<8x8xf32>
    %33 = vector.extract_strided_slice %16 {offsets = [0, 8], sizes = [8, 8], strides = [1, 1]} : vector<8x32xf32> to vector<8x8xf32>
    %34 = vector.extract_strided_slice %5 {offsets = [0, 8], sizes = [8, 8], strides = [1, 1]} : vector<8x64xf32> to vector<8x8xf32>
    %35 = vector.extract_strided_slice %5 {offsets = [0, 40], sizes = [8, 8], strides = [1, 1]} : vector<8x64xf32> to vector<8x8xf32>
    %cst_17 = arith.constant dense<0.000000e+00> : vector<8x8xf32>
    %36 = tpu.matmul %33, %34, %cst_17 {dimension_numbers = #tpu.dot_dimension_numbers<[1], [1], [0], [0], [0, 0, 1, 0], [], []>} : vector<8x8xf32>, vector<8x8xf32>, vector<8x8xf32> -> vector<8x8xf32>
    %37 = arith.addf %36, %11 : vector<8x8xf32>
    %cst_18 = arith.constant dense<0xFF800000> : vector<8xf32>
    %38 = vector.multi_reduction <maximumf>, %37, %cst_18 [1] : vector<8x8xf32> to vector<8xf32>
    %39 = vector.shape_cast %38 : vector<8xf32> to vector<8x1xf32>
    %40 = vector.broadcast %39 : vector<8x1xf32> to vector<8x8xf32>
    %41 = arith.subf %37, %40 : vector<8x8xf32>
    %42 = math.exp %41 : vector<8x8xf32>
    %cst_19 = arith.constant dense<0.000000e+00> : vector<8xf32>
    %43 = vector.multi_reduction <add>, %42, %cst_19 [1] : vector<8x8xf32> to vector<8xf32>
    %44 = vector.shape_cast %43 : vector<8xf32> to vector<8x1xf32>
    %45 = tpu.reciprocal %44 {approx = true} : vector<8x1xf32> -> vector<8x1xf32>
    %46 = vector.broadcast %45 : vector<8x1xf32> to vector<8x8xf32>
    %47 = arith.mulf %42, %46 : vector<8x8xf32>
    %cst_20 = arith.constant dense<0.000000e+00> : vector<8x8xf32>
    %48 = tpu.matmul %47, %35, %cst_20 {dimension_numbers = #tpu.dot_dimension_numbers<[1], [0], [0], [1], [0, 0, 1, 1], [], []>} : vector<8x8xf32>, vector<8x8xf32>, vector<8x8xf32> -> vector<8x8xf32>
    %49 = vector.extract_strided_slice %16 {offsets = [0, 16], sizes = [8, 8], strides = [1, 1]} : vector<8x32xf32> to vector<8x8xf32>
    %50 = vector.extract_strided_slice %5 {offsets = [0, 16], sizes = [8, 8], strides = [1, 1]} : vector<8x64xf32> to vector<8x8xf32>
    %51 = vector.extract_strided_slice %5 {offsets = [0, 48], sizes = [8, 8], strides = [1, 1]} : vector<8x64xf32> to vector<8x8xf32>
    %cst_21 = arith.constant dense<0.000000e+00> : vector<8x8xf32>
    %52 = tpu.matmul %49, %50, %cst_21 {dimension_numbers = #tpu.dot_dimension_numbers<[1], [1], [0], [0], [0, 0, 1, 0], [], []>} : vector<8x8xf32>, vector<8x8xf32>, vector<8x8xf32> -> vector<8x8xf32>
    %53 = arith.addf %52, %11 : vector<8x8xf32>
    %cst_22 = arith.constant dense<0xFF800000> : vector<8xf32>
    %54 = vector.multi_reduction <maximumf>, %53, %cst_22 [1] : vector<8x8xf32> to vector<8xf32>
    %55 = vector.shape_cast %54 : vector<8xf32> to vector<8x1xf32>
    %56 = vector.broadcast %55 : vector<8x1xf32> to vector<8x8xf32>
    %57 = arith.subf %53, %56 : vector<8x8xf32>
    %58 = math.exp %57 : vector<8x8xf32>
    %cst_23 = arith.constant dense<0.000000e+00> : vector<8xf32>
    %59 = vector.multi_reduction <add>, %58, %cst_23 [1] : vector<8x8xf32> to vector<8xf32>
    %60 = vector.shape_cast %59 : vector<8xf32> to vector<8x1xf32>
    %61 = tpu.reciprocal %60 {approx = true} : vector<8x1xf32> -> vector<8x1xf32>
    %62 = vector.broadcast %61 : vector<8x1xf32> to vector<8x8xf32>
    %63 = arith.mulf %58, %62 : vector<8x8xf32>
    %cst_24 = arith.constant dense<0.000000e+00> : vector<8x8xf32>
    %64 = tpu.matmul %63, %51, %cst_24 {dimension_numbers = #tpu.dot_dimension_numbers<[1], [0], [0], [1], [0, 0, 1, 1], [], []>} : vector<8x8xf32>, vector<8x8xf32>, vector<8x8xf32> -> vector<8x8xf32>
    %65 = vector.extract_strided_slice %16 {offsets = [0, 24], sizes = [8, 8], strides = [1, 1]} : vector<8x32xf32> to vector<8x8xf32>
    %66 = vector.extract_strided_slice %5 {offsets = [0, 24], sizes = [8, 8], strides = [1, 1]} : vector<8x64xf32> to vector<8x8xf32>
    %67 = vector.extract_strided_slice %5 {offsets = [0, 56], sizes = [8, 8], strides = [1, 1]} : vector<8x64xf32> to vector<8x8xf32>
    %cst_25 = arith.constant dense<0.000000e+00> : vector<8x8xf32>
    %68 = tpu.matmul %65, %66, %cst_25 {dimension_numbers = #tpu.dot_dimension_numbers<[1], [1], [0], [0], [0, 0, 1, 0], [], []>} : vector<8x8xf32>, vector<8x8xf32>, vector<8x8xf32> -> vector<8x8xf32>
    %69 = arith.addf %68, %11 : vector<8x8xf32>
    %cst_26 = arith.constant dense<0xFF800000> : vector<8xf32>
    %70 = vector.multi_reduction <maximumf>, %69, %cst_26 [1] : vector<8x8xf32> to vector<8xf32>
    %71 = vector.shape_cast %70 : vector<8xf32> to vector<8x1xf32>
    %72 = vector.broadcast %71 : vector<8x1xf32> to vector<8x8xf32>
    %73 = arith.subf %69, %72 : vector<8x8xf32>
    %74 = math.exp %73 : vector<8x8xf32>
    %cst_27 = arith.constant dense<0.000000e+00> : vector<8xf32>
    %75 = vector.multi_reduction <add>, %74, %cst_27 [1] : vector<8x8xf32> to vector<8xf32>
    %76 = vector.shape_cast %75 : vector<8xf32> to vector<8x1xf32>
    %77 = tpu.reciprocal %76 {approx = true} : vector<8x1xf32> -> vector<8x1xf32>
    %78 = vector.broadcast %77 : vector<8x1xf32> to vector<8x8xf32>
    %79 = arith.mulf %74, %78 : vector<8x8xf32>
    %cst_28 = arith.constant dense<0.000000e+00> : vector<8x8xf32>
    %80 = tpu.matmul %79, %67, %cst_28 {dimension_numbers = #tpu.dot_dimension_numbers<[1], [0], [0], [1], [0, 0, 1, 1], [], []>} : vector<8x8xf32>, vector<8x8xf32>, vector<8x8xf32> -> vector<8x8xf32>
    %81 = tpu.concatenate %32, %48, %64, %80 in 1 : vector<8x8xf32>, vector<8x8xf32>, vector<8x8xf32>, vector<8x8xf32> -> vector<8x32xf32>
    %c0_29 = arith.constant 0 : index
    %c0_30 = arith.constant 0 : index
    %82 = vector.load %arg9[%c0_29, %c0_30] : memref<32x32xf32, #tpu.memory_space<vmem>>, vector<32x32xf32>
    %cst_31 = arith.constant dense<0.000000e+00> : vector<8x32xf32>
    %83 = tpu.matmul %81, %82, %cst_31 {dimension_numbers = #tpu.dot_dimension_numbers<[1], [0], [0], [1], [0, 0, 1, 1], [], []>} : vector<8x32xf32>, vector<32x32xf32>, vector<8x32xf32> -> vector<8x32xf32>
    %c0_32 = arith.constant 0 : index
    %c0_33 = arith.constant 0 : index
    %84 = vector.load %arg10[%c0_32, %c0_33] : memref<1x32xf32, #tpu.memory_space<vmem>>, vector<1x32xf32>
    %85 = vector.broadcast %84 : vector<1x32xf32> to vector<8x32xf32>
    %86 = arith.addf %83, %85 : vector<8x32xf32>
    %87 = arith.addf %1, %86 : vector<8x32xf32>
    %c0_34 = arith.constant 0 : index
    %c0_35 = arith.constant 0 : index
    %88 = vector.load %arg11[%c0_34, %c0_35] : memref<1x32xf32, #tpu.memory_space<vmem>>, vector<1x32xf32>
    %c0_36 = arith.constant 0 : index
    %c0_37 = arith.constant 0 : index
    %89 = vector.load %arg12[%c0_36, %c0_37] : memref<1x32xf32, #tpu.memory_space<vmem>>, vector<1x32xf32>
    %cst_38 = arith.constant dense<0.000000e+00> : vector<8xf32>
    %90 = vector.multi_reduction <add>, %87, %cst_38 [1] : vector<8x32xf32> to vector<8xf32>
    %91 = vector.shape_cast %90 : vector<8xf32> to vector<8x1xf32>
    %cst_39 = arith.constant 3.200000e+01 : f32
    %92 = vector.broadcast %cst_39 : f32 to vector<8x1xf32>
    %93 = arith.divf %91, %92 : vector<8x1xf32>
    %94 = arith.mulf %87, %87 : vector<8x32xf32>
    %cst_40 = arith.constant dense<0.000000e+00> : vector<8xf32>
    %95 = vector.multi_reduction <add>, %94, %cst_40 [1] : vector<8x32xf32> to vector<8xf32>
    %96 = vector.shape_cast %95 : vector<8xf32> to vector<8x1xf32>
    %cst_41 = arith.constant 3.200000e+01 : f32
    %97 = vector.broadcast %cst_41 : f32 to vector<8x1xf32>
    %98 = arith.divf %96, %97 : vector<8x1xf32>
    %99 = arith.mulf %93, %93 : vector<8x1xf32>
    %100 = arith.subf %98, %99 : vector<8x1xf32>
    %cst_42 = arith.constant 0.000000e+00 : f32
    %101 = vector.broadcast %cst_42 : f32 to vector<8x1xf32>
    %102 = arith.maximumf %100, %101 : vector<8x1xf32>
    %103 = vector.broadcast %93 : vector<8x1xf32> to vector<8x32xf32>
    %104 = arith.subf %87, %103 : vector<8x32xf32>
    %cst_43 = arith.constant 9.99999997E-7 : f32
    %105 = vector.broadcast %cst_43 : f32 to vector<8x1xf32>
    %106 = arith.addf %102, %105 : vector<8x1xf32>
    %107 = math.rsqrt %106 : vector<8x1xf32>
    %108 = vector.broadcast %107 : vector<8x1xf32> to vector<8x32xf32>
    %109 = arith.mulf %104, %108 : vector<8x32xf32>
    %110 = vector.broadcast %88 : vector<1x32xf32> to vector<8x32xf32>
    %111 = arith.mulf %109, %110 : vector<8x32xf32>
    %112 = vector.broadcast %89 : vector<1x32xf32> to vector<8x32xf32>
    %113 = arith.addf %111, %112 : vector<8x32xf32>
    %c0_44 = arith.constant 0 : index
    %c0_45 = arith.constant 0 : index
    %114 = vector.load %arg13[%c0_44, %c0_45] : memref<32x64xf32, #tpu.memory_space<vmem>>, vector<32x64xf32>
    %cst_46 = arith.constant dense<0.000000e+00> : vector<8x64xf32>
    %115 = tpu.matmul %113, %114, %cst_46 {dimension_numbers = #tpu.dot_dimension_numbers<[1], [0], [0], [1], [0, 0, 1, 1], [], []>} : vector<8x32xf32>, vector<32x64xf32>, vector<8x64xf32> -> vector<8x64xf32>
    %c0_47 = arith.constant 0 : index
    %c0_48 = arith.constant 0 : index
    %116 = vector.load %arg14[%c0_47, %c0_48] : memref<1x64xf32, #tpu.memory_space<vmem>>, vector<1x64xf32>
    %117 = vector.broadcast %116 : vector<1x64xf32> to vector<8x64xf32>
    %118 = arith.addf %115, %117 : vector<8x64xf32>
    %cst_49 = arith.constant 0.000000e+00 : f32
    %119 = vector.broadcast %cst_49 : f32 to vector<8x64xf32>
    %120 = arith.maximumf %118, %119 : vector<8x64xf32>
    %c0_50 = arith.constant 0 : index
    %c0_51 = arith.constant 0 : index
    %121 = vector.load %arg15[%c0_50, %c0_51] : memref<64x32xf32, #tpu.memory_space<vmem>>, vector<64x32xf32>
    %cst_52 = arith.constant dense<0.000000e+00> : vector<8x32xf32>
    %122 = tpu.matmul %120, %121, %cst_52 {dimension_numbers = #tpu.dot_dimension_numbers<[1], [0], [0], [1], [0, 0, 1, 1], [], []>} : vector<8x64xf32>, vector<64x32xf32>, vector<8x32xf32> -> vector<8x32xf32>
    %c0_53 = arith.constant 0 : index
    %c0_54 = arith.constant 0 : index
    %123 = vector.load %arg16[%c0_53, %c0_54] : memref<1x32xf32, #tpu.memory_space<vmem>>, vector<1x32xf32>
    %124 = vector.broadcast %123 : vector<1x32xf32> to vector<8x32xf32>
    %125 = arith.addf %122, %124 : vector<8x32xf32>
    %126 = arith.addf %113, %125 : vector<8x32xf32>
    %c0_55 = arith.constant 0 : index
    %c0_56 = arith.constant 0 : index
    %127 = vector.load %arg17[%c0_55, %c0_56] : memref<1x32xf32, #tpu.memory_space<vmem>>, vector<1x32xf32>
    %c0_57 = arith.constant 0 : index
    %c0_58 = arith.constant 0 : index
    %128 = vector.load %arg18[%c0_57, %c0_58] : memref<1x32xf32, #tpu.memory_space<vmem>>, vector<1x32xf32>
    %cst_59 = arith.constant dense<0.000000e+00> : vector<8xf32>
    %129 = vector.multi_reduction <add>, %126, %cst_59 [1] : vector<8x32xf32> to vector<8xf32>
    %130 = vector.shape_cast %129 : vector<8xf32> to vector<8x1xf32>
    %cst_60 = arith.constant 3.200000e+01 : f32
    %131 = vector.broadcast %cst_60 : f32 to vector<8x1xf32>
    %132 = arith.divf %130, %131 : vector<8x1xf32>
    %133 = arith.mulf %126, %126 : vector<8x32xf32>
    %cst_61 = arith.constant dense<0.000000e+00> : vector<8xf32>
    %134 = vector.multi_reduction <add>, %133, %cst_61 [1] : vector<8x32xf32> to vector<8xf32>
    %135 = vector.shape_cast %134 : vector<8xf32> to vector<8x1xf32>
    %cst_62 = arith.constant 3.200000e+01 : f32
    %136 = vector.broadcast %cst_62 : f32 to vector<8x1xf32>
    %137 = arith.divf %135, %136 : vector<8x1xf32>
    %138 = arith.mulf %132, %132 : vector<8x1xf32>
    %139 = arith.subf %137, %138 : vector<8x1xf32>
    %cst_63 = arith.constant 0.000000e+00 : f32
    %140 = vector.broadcast %cst_63 : f32 to vector<8x1xf32>
    %141 = arith.maximumf %139, %140 : vector<8x1xf32>
    %142 = vector.broadcast %132 : vector<8x1xf32> to vector<8x32xf32>
    %143 = arith.subf %126, %142 : vector<8x32xf32>
    %cst_64 = arith.constant 9.99999997E-7 : f32
    %144 = vector.broadcast %cst_64 : f32 to vector<8x1xf32>
    %145 = arith.addf %141, %144 : vector<8x1xf32>
    %146 = math.rsqrt %145 : vector<8x1xf32>
    %147 = vector.broadcast %146 : vector<8x1xf32> to vector<8x32xf32>
    %148 = arith.mulf %143, %147 : vector<8x32xf32>
    %149 = vector.broadcast %127 : vector<1x32xf32> to vector<8x32xf32>
    %150 = arith.mulf %148, %149 : vector<8x32xf32>
    %151 = vector.broadcast %128 : vector<1x32xf32> to vector<8x32xf32>
    %152 = arith.addf %150, %151 : vector<8x32xf32>
    %c0_65 = arith.constant 0 : index
    %c0_66 = arith.constant 0 : index
    %c0_67 = arith.constant 0 : index
    %153 = vector.load %arg19[%c0_65, %c0_66, %c0_67] : memref<1x8x32xf32, #tpu.memory_space<vmem>>, vector<1x8x32xf32>
    %154 = vector.shape_cast %153 : vector<1x8x32xf32> to vector<8x32xf32>
    %155 = vector.shape_cast %152 : vector<8x32xf32> to vector<1x8x32xf32>
    tpu.vector_store %arg19[%c0_65, %c0_66, %c0_67], %155 {strides = array<i32>} : memref<1x8x32xf32, #tpu.memory_space<vmem>>, vector<1x8x32xf32>,
    return
  }
  func.func @transform_0(%arg0: i32, %arg1: i32) -> (i32, i32, i32) {
    %c0_i32 = arith.constant 0 : i32
    %c0_i32_0 = arith.constant 0 : i32
    return %arg0, %arg1, %c0_i32 : i32, i32, i32
  }
  func.func @transform_1(%arg0: i32, %arg1: i32) -> (i32, i32, i32) {
    %c0_i32 = arith.constant 0 : i32
    %c0_i32_0 = arith.constant 0 : i32
    %c0_i32_1 = arith.constant 0 : i32
    return %arg0, %c0_i32, %c0_i32_0 : i32, i32, i32
  }
  func.func @transform_2(%arg0: i32, %arg1: i32) -> (i32, i32, i32) {
    %c0_i32 = arith.constant 0 : i32
    %c0_i32_0 = arith.constant 0 : i32
    %c0_i32_1 = arith.constant 0 : i32
    return %arg0, %c0_i32, %c0_i32_0 : i32, i32, i32
  }
  func.func @transform_3(%arg0: i32, %arg1: i32) -> (i32, i32) {
    %c0_i32 = arith.constant 0 : i32
    %c0_i32_0 = arith.constant 0 : i32
    %c0_i32_1 = arith.constant 0 : i32
    return %c0_i32, %c0_i32_0 : i32, i32
  }
  func.func @transform_4(%arg0: i32, %arg1: i32) -> (i32, i32) {
    %c0_i32 = arith.constant 0 : i32
    %c0_i32_0 = arith.constant 0 : i32
    %c0_i32_1 = arith.constant 0 : i32
    return %c0_i32, %c0_i32_0 : i32, i32
  }
  func.func @transform_5(%arg0: i32, %arg1: i32) -> (i32, i32) {
    %c0_i32 = arith.constant 0 : i32
    %c0_i32_0 = arith.constant 0 : i32
    %c0_i32_1 = arith.constant 0 : i32
    return %c0_i32, %c0_i32_0 : i32, i32
  }
  func.func @transform_6(%arg0: i32, %arg1: i32) -> (i32, i32) {
    %c0_i32 = arith.constant 0 : i32
    %c0_i32_0 = arith.constant 0 : i32
    %c0_i32_1 = arith.constant 0 : i32
    return %c0_i32, %c0_i32_0 : i32, i32
  }
  func.func @transform_7(%arg0: i32, %arg1: i32) -> (i32, i32) {
    %c0_i32 = arith.constant 0 : i32
    %c0_i32_0 = arith.constant 0 : i32
    %c0_i32_1 = arith.constant 0 : i32
    return %c0_i32, %c0_i32_0 : i32, i32
  }
  func.func @transform_8(%arg0: i32, %arg1: i32) -> (i32, i32) {
    %c0_i32 = arith.constant 0 : i32
    %c0_i32_0 = arith.constant 0 : i32
    %c0_i32_1 = arith.constant 0 : i32
    return %c0_i32, %c0_i32_0 : i32, i32
  }
  func.func @transform_9(%arg0: i32, %arg1: i32) -> (i32, i32) {
    %c0_i32 = arith.constant 0 : i32
    %c0_i32_0 = arith.constant 0 : i32
    %c0_i32_1 = arith.constant 0 : i32
    return %c0_i32, %c0_i32_0 : i32, i32
  }
  func.func @transform_10(%arg0: i32, %arg1: i32) -> (i32, i32) {
    %c0_i32 = arith.constant 0 : i32
    %c0_i32_0 = arith.constant 0 : i32
    %c0_i32_1 = arith.constant 0 : i32
    return %c0_i32, %c0_i32_0 : i32, i32
  }
  func.func @transform_11(%arg0: i32, %arg1: i32) -> (i32, i32) {
    %c0_i32 = arith.constant 0 : i32
    %c0_i32_0 = arith.constant 0 : i32
    %c0_i32_1 = arith.constant 0 : i32
    return %c0_i32, %c0_i32_0 : i32, i32
  }
  func.func @transform_12(%arg0: i32, %arg1: i32) -> (i32, i32) {
    %c0_i32 = arith.constant 0 : i32
    %c0_i32_0 = arith.constant 0 : i32
    %c0_i32_1 = arith.constant 0 : i32
    return %c0_i32, %c0_i32_0 : i32, i32
  }
  func.func @transform_13(%arg0: i32, %arg1: i32) -> (i32, i32) {
    %c0_i32 = arith.constant 0 : i32
    %c0_i32_0 = arith.constant 0 : i32
    %c0_i32_1 = arith.constant 0 : i32
    return %c0_i32, %c0_i32_0 : i32, i32
  }
  func.func @transform_14(%arg0: i32, %arg1: i32) -> (i32, i32) {
    %c0_i32 = arith.constant 0 : i32
    %c0_i32_0 = arith.constant 0 : i32
    %c0_i32_1 = arith.constant 0 : i32
    return %c0_i32, %c0_i32_0 : i32, i32
  }
  func.func @transform_15(%arg0: i32, %arg1: i32) -> (i32, i32) {
    %c0_i32 = arith.constant 0 : i32
    %c0_i32_0 = arith.constant 0 : i32
    %c0_i32_1 = arith.constant 0 : i32
    return %c0_i32, %c0_i32_0 : i32, i32
  }
  func.func @transform_16(%arg0: i32, %arg1: i32) -> (i32, i32) {
    %c0_i32 = arith.constant 0 : i32
    %c0_i32_0 = arith.constant 0 : i32
    %c0_i32_1 = arith.constant 0 : i32
    return %c0_i32, %c0_i32_0 : i32, i32
  }
  func.func @transform_17(%arg0: i32, %arg1: i32) -> (i32, i32, i32) {
    %c0_i32 = arith.constant 0 : i32
    %c0_i32_0 = arith.constant 0 : i32
    return %arg0, %arg1, %c0_i32 : i32, i32, i32
  }
}

module attributes {stable_mosaic.version = 11 : i64} {
  func.func @enc_layer_kernel(%arg0: i32, %arg1: i32, %arg2: memref<1x8x32xf32, #tpu.memory_space<vmem>>, %arg3: memref<1x8x32xf32, #tpu.memory_space<vmem>>, %arg4: memref<1x1x8xf32, #tpu.memory_space<vmem>>, %arg5: memref<32x32xf32, #tpu.memory_space<vmem>>, %arg6: memref<1x32xf32, #tpu.memory_space<vmem>>, %arg7: memref<32x64xf32, #tpu.memory_space<vmem>>, %arg8: memref<1x64xf32, #tpu.memory_space<vmem>>, %arg9: memref<32x32xf32, #tpu.memory_space<vmem>>, %arg10: memref<1x32xf32, #tpu.memory_space<vmem>>, %arg11: memref<1x32xf32, #tpu.memory_space<vmem>>, %arg12: memref<1x32xf32, #tpu.memory_space<vmem>>, %arg13: memref<32x64xf32, #tpu.memory_space<vmem>>, %arg14: memref<1x64xf32, #tpu.memory_space<vmem>>, %arg15: memref<64x32xf32, #tpu.memory_space<vmem>>, %arg16: memref<1x32xf32, #tpu.memory_space<vmem>>, %arg17: memref<1x32xf32, #tpu.memory_space<vmem>>, %arg18: memref<1x32xf32, #tpu.memory_space<vmem>>, %arg19: memref<1x8x32xf32, #tpu.memory_space<vmem>>, %arg20: memref<8x64xf32, #tpu.memory_space<vmem>>) attributes {dimension_semantics = [#tpu.dimension_semantics<parallel>, #tpu.dimension_semantics<arbitrary>], iteration_bounds = array<i64: 2, 1>, scalar_prefetch = 0 : i64, scratch_operands = 1 : i64, tpu.core_type = #tpu.core_type<tc>, window_params = [{transform_indices = @transform_0, window_bounds = array<i64: 1, 8, 32>}, {transform_indices = @transform_1, window_bounds = array<i64: 1, 8, 32>}, {transform_indices = @transform_2, window_bounds = array<i64: 1, 1, 8>}, {pipeline_mode = #tpu.pipeline_mode<synchronous>, transform_indices = @transform_3, window_bounds = array<i64: 32, 32>}, {pipeline_mode = #tpu.pipeline_mode<synchronous>, transform_indices = @transform_4, window_bounds = array<i64: 1, 32>}, {pipeline_mode = #tpu.pipeline_mode<synchronous>, transform_indices = @transform_5, window_bounds = array<i64: 32, 64>}, {pipeline_mode = #tpu.pipeline_mode<synchronous>, transform_indices = @transform_6, window_bounds = array<i64: 1, 64>}, {pipeline_mode = #tpu.pipeline_mode<synchronous>, transform_indices = @transform_7, window_bounds = array<i64: 32, 32>}, {pipeline_mode = #tpu.pipeline_mode<synchronous>, transform_indices = @transform_8, window_bounds = array<i64: 1, 32>}, {pipeline_mode = #tpu.pipeline_mode<synchronous>, transform_indices = @transform_9, window_bounds = array<i64: 1, 32>}, {pipeline_mode = #tpu.pipeline_mode<synchronous>, transform_indices = @transform_10, window_bounds = array<i64: 1, 32>}, {pipeline_mode = #tpu.pipeline_mode<synchronous>, transform_indices = @transform_11, window_bounds = array<i64: 32, 64>}, {pipeline_mode = #tpu.pipeline_mode<synchronous>, transform_indices = @transform_12, window_bounds = array<i64: 1, 64>}, {pipeline_mode = #tpu.pipeline_mode<synchronous>, transform_indices = @transform_13, window_bounds = array<i64: 64, 32>}, {pipeline_mode = #tpu.pipeline_mode<synchronous>, transform_indices = @transform_14, window_bounds = array<i64: 1, 32>}, {pipeline_mode = #tpu.pipeline_mode<synchronous>, transform_indices = @transform_15, window_bounds = array<i64: 1, 32>}, {pipeline_mode = #tpu.pipeline_mode<synchronous>, transform_indices = @transform_16, window_bounds = array<i64: 1, 32>}, {transform_indices = @transform_17, window_bounds = array<i64: 1, 8, 32>}]} {
    %c0 = arith.constant 0 : index
    %c0_0 = arith.constant 0 : index
    %c0_1 = arith.constant 0 : index
    %0 = vector.load %arg2[%c0, %c0_0, %c0_1] : memref<1x8x32xf32, #tpu.memory_space<vmem>>, vector<1x8x32xf32>
    %1 = vector.shape_cast %0 : vector<1x8x32xf32> to vector<8x32xf32>
    %c0_i32 = arith.constant 0 : i32
    %2 = arith.cmpi eq, %arg1, %c0_i32 : i32
    %3 = arith.extui %2 : i1 to i32
    %c0_i32_2 = arith.constant 0 : i32
    %4 = arith.cmpi ne, %3, %c0_i32_2 : i32
    scf.if %4 {
      %c0_68 = arith.constant 0 : index
      %c0_69 = arith.constant 0 : index
      %c0_70 = arith.constant 0 : index
      %156 = vector.load %arg3[%c0_68, %c0_69, %c0_70] : memref<1x8x32xf32, #tpu.memory_space<vmem>>, vector<1x8x32xf32>
      %157 = vector.shape_cast %156 : vector<1x8x32xf32> to vector<8x32xf32>
      %c0_71 = arith.constant 0 : index
      %c0_72 = arith.constant 0 : index
      %158 = vector.load %arg7[%c0_71, %c0_72] : memref<32x64xf32, #tpu.memory_space<vmem>>, vector<32x64xf32>
      %cst_73 = arith.constant dense<0.000000e+00> : vector<8x64xf32>
      %159 = tpu.matmul %157, %158, %cst_73 {dimension_numbers = #tpu.dot_dimension_numbers<[1], [0], [0], [1], [0, 0, 1, 1], [], []>} : vector<8x32xf32>, vector<32x64xf32>, vector<8x64xf32> -> vector<8x64xf32>
      %c0_74 = arith.constant 0 : index
      %c0_75 = arith.constant 0 : index
      %160 = vector.load %arg8[%c0_74, %c0_75] : memref<1x64xf32, #tpu.memory_space<vmem>>, vector<1x64xf32>
      %161 = vector.broadcast %160 : vector<1x64xf32> to vector<8x64xf32>
      %162 = arith.addf %159, %161 : vector<8x64xf32>
      %c0_76 = arith.constant 0 : index
      %c0_77 = arith.constant 0 : index
      %163 = vector.load %arg20[%c0_76, %c0_77] : memref<8x64xf32, #tpu.memory_space<vmem>>, vector<8x64xf32>
      tpu.vector_store %arg20[%c0_76, %c0_77], %162 {strides = array<i32>} : memref<8x64xf32, #tpu.memory_space<vmem>>, vector<8x64xf32>,
    } else {
    }
    %c0_3 = arith.constant 0 : index
    %c0_4 = arith.constant 0 : index
    %5 = vector.load %arg20[%c0_3, %c0_4] : memref<8x64xf32, #tpu.memory_space<vmem>>, vector<8x64xf32>
    %c0_5 = arith.constant 0 : index
    %c0_6 = arith.constant 0 : index
    %c0_7 = arith.constant 0 : index
    %6 = vector.load %arg4[%c0_5, %c0_6, %c0_7] : memref<1x1x8xf32, #tpu.memory_space<vmem>>, vector<1x1x8xf32>
    %7 = vector.shape_cast %6 : vector<1x1x8xf32> to vector<1x8xf32>
    %cst = arith.constant -1.000000e+09 : f32
    %8 = vector.broadcast %cst : f32 to vector<1x8xf32>
    %9 = arith.mulf %7, %8 : vector<1x8xf32>
    %10 = vector.shape_cast %9 : vector<1x8xf32> to vector<1x8xf32>
    %11 = vector.broadcast %10 : vector<1x8xf32> to vector<8x8xf32>
    %c0_8 = arith.constant 0 : index
    %c0_9 = arith.constant 0 : index
    %12 = vector.load %arg5[%c0_8, %c0_9] : memref<32x32xf32, #tpu.memory_space<vmem>>, vector<32x32xf32>
    %cst_10 = arith.constant dense<0.000000e+00> : vector<8x32xf32>
    %13 = tpu.matmul %1, %12, %cst_10 {dimension_numbers = #tpu.dot_dimension_numbers<[1], [0], [0], [1], [0, 0, 1, 1], [], []>} : vector<8x32xf32>, vector<32x32xf32>, vector<8x32xf32> -> vector<8x32xf32>
    %c0_11 = arith.constant 0 : index
    %c0_12 = arith.constant 0 : index
    %14 = vector.load %arg6[%c0_11, %c0_12] : memref<1x32xf32, #tpu.memory_space<vmem>>, vector<1x32xf32>
    %15 = vector.broadcast %14 : vector<1x32xf32> to vector<8x32xf32>
    %16 = arith.addf %13, %15 : vector<8x32xf32>
    %17 = vector.extract_strided_slice %16 {offsets = [0, 0], sizes = [8, 8], strides = [1, 1]} : vector<8x32xf32> to vector<8x8xf32>
    %18 = vector.extract_strided_slice %5 {offsets = [0, 0], sizes = [8, 8], strides = [1, 1]} : vector<8x64xf32> to vector<8x8xf32>
    %19 = vector.extract_strided_slice %5 {offsets = [0, 32], sizes = [8, 8], strides = [1, 1]} : vector<8x64xf32> to vector<8x8xf32>
    %cst_13 = arith.constant dense<0.000000e+00> : vector<8x8xf32>
    %20 = tpu.matmul %17, %18, %cst_13 {dimension_numbers = #tpu.dot_dimension_numbers<[1], [1], [0], [0], [0, 0, 1, 0], [], []>} : vector<8x8xf32>, vector<8x8xf32>, vector<8x8xf32> -> vector<8x8xf32>
    %21 = arith.addf %20, %11 : vector<8x8xf32>
    %cst_14 = arith.constant dense<0xFF800000> : vector<8xf32>
    %22 = vector.multi_reduction <maximumf>, %21, %cst_14 [1] : vector<8x8xf32> to vector<8xf32>
    %23 = vector.shape_cast %22 : vector<8xf32> to vector<8x1xf32>
    %24 = vector.broadcast %23 : vector<8x1xf32> to vector<8x8xf32>
    %25 = arith.subf %21, %24 : vector<8x8xf32>
    %26 = math.exp %25 : vector<8x8xf32>
    %cst_15 = arith.constant dense<0.000000e+00> : vector<8xf32>
    %27 = vector.multi_reduction <add>, %26, %cst_15 [1] : vector<8x8xf32> to vector<8xf32>
    %28 = vector.shape_cast %27 : vector<8xf32> to vector<8x1xf32>
    %29 = tpu.reciprocal %28 {approx = true} : vector<8x1xf32> -> vector<8x1xf32>
    %30 = vector.broadcast %29 : vector<8x1xf32> to vector<8x8xf32>
    %31 = arith.mulf %26, %30 : vector<8x8xf32>
    %cst_16 = arith.constant dense<0.000000e+00> : vector<8x8xf32>
    %32 = tpu.matmul %31, %19, %cst_16 {dimension_numbers = #tpu.dot_dimension_numbers<[1], [0], [0], [1], [0, 0, 1, 1], [], []>} : vector<8x8xf32>, vector<8x8xf32>, vector<8x8xf32> -> vector<8x8xf32>
    %33 = vector.extract_strided_slice %16 {offsets = [0, 8], sizes = [8, 8], strides = [1, 1]} : vector<8x32xf32> to vector<8x8xf32>
    %34 = vector.extract_strided_slice %5 {offsets = [0, 8], sizes = [8, 8], strides = [1, 1]} : vector<8x64xf32> to vector<8x8xf32>
    %35 = vector.extract_strided_slice %5 {offsets = [0, 40], sizes = [8, 8], strides = [1, 1]} : vector<8x64xf32> to vector<8x8xf32>
    %cst_17 = arith.constant dense<0.000000e+00> : vector<8x8xf32>
    %36 = tpu.matmul %33, %34, %cst_17 {dimension_numbers = #tpu.dot_dimension_numbers<[1], [1], [0], [0], [0, 0, 1, 0], [], []>} : vector<8x8xf32>, vector<8x8xf32>, vector<8x8xf32> -> vector<8x8xf32>
    %37 = arith.addf %36, %11 : vector<8x8xf32>
    %cst_18 = arith.constant dense<0xFF800000> : vector<8xf32>
    %38 = vector.multi_reduction <maximumf>, %37, %cst_18 [1] : vector<8x8xf32> to vector<8xf32>
    %39 = vector.shape_cast %38 : vector<8xf32> to vector<8x1xf32>
    %40 = vector.broadcast %39 : vector<8x1xf32> to vector<8x8xf32>
    %41 = arith.subf %37, %40 : vector<8x8xf32>
    %42 = math.exp %41 : vector<8x8xf32>
    %cst_19 = arith.constant dense<0.000000e+00> : vector<8xf32>
    %43 = vector.multi_reduction <add>, %42, %cst_19 [1] : vector<8x8xf32> to vector<8xf32>
    %44 = vector.shape_cast %43 : vector<8xf32> to vector<8x1xf32>
    %45 = tpu.reciprocal %44 {approx = true} : vector<8x1xf32> -> vector<8x1xf32>
    %46 = vector.broadcast %45 : vector<8x1xf32> to vector<8x8xf32>
    %47 = arith.mulf %42, %46 : vector<8x8xf32>
    %cst_20 = arith.constant dense<0.000000e+00> : vector<8x8xf32>
    %48 = tpu.matmul %47, %35, %cst_20 {dimension_numbers = #tpu.dot_dimension_numbers<[1], [0], [0], [1], [0, 0, 1, 1], [], []>} : vector<8x8xf32>, vector<8x8xf32>, vector<8x8xf32> -> vector<8x8xf32>
    %49 = vector.extract_strided_slice %16 {offsets = [0, 16], sizes = [8, 8], strides = [1, 1]} : vector<8x32xf32> to vector<8x8xf32>
    %50 = vector.extract_strided_slice %5 {offsets = [0, 16], sizes = [8, 8], strides = [1, 1]} : vector<8x64xf32> to vector<8x8xf32>
    %51 = vector.extract_strided_slice %5 {offsets = [0, 48], sizes = [8, 8], strides = [1, 1]} : vector<8x64xf32> to vector<8x8xf32>
    %cst_21 = arith.constant dense<0.000000e+00> : vector<8x8xf32>
    %52 = tpu.matmul %49, %50, %cst_21 {dimension_numbers = #tpu.dot_dimension_numbers<[1], [1], [0], [0], [0, 0, 1, 0], [], []>} : vector<8x8xf32>, vector<8x8xf32>, vector<8x8xf32> -> vector<8x8xf32>
    %53 = arith.addf %52, %11 : vector<8x8xf32>
    %cst_22 = arith.constant dense<0xFF800000> : vector<8xf32>
    %54 = vector.multi_reduction <maximumf>, %53, %cst_22 [1] : vector<8x8xf32> to vector<8xf32>
    %55 = vector.shape_cast %54 : vector<8xf32> to vector<8x1xf32>
    %56 = vector.broadcast %55 : vector<8x1xf32> to vector<8x8xf32>
    %57 = arith.subf %53, %56 : vector<8x8xf32>
    %58 = math.exp %57 : vector<8x8xf32>
    %cst_23 = arith.constant dense<0.000000e+00> : vector<8xf32>
    %59 = vector.multi_reduction <add>, %58, %cst_23 [1] : vector<8x8xf32> to vector<8xf32>
    %60 = vector.shape_cast %59 : vector<8xf32> to vector<8x1xf32>
    %61 = tpu.reciprocal %60 {approx = true} : vector<8x1xf32> -> vector<8x1xf32>
    %62 = vector.broadcast %61 : vector<8x1xf32> to vector<8x8xf32>
    %63 = arith.mulf %58, %62 : vector<8x8xf32>
    %cst_24 = arith.constant dense<0.000000e+00> : vector<8x8xf32>
    %64 = tpu.matmul %63, %51, %cst_24 {dimension_numbers = #tpu.dot_dimension_numbers<[1], [0], [0], [1], [0, 0, 1, 1], [], []>} : vector<8x8xf32>, vector<8x8xf32>, vector<8x8xf32> -> vector<8x8xf32>
    %65 = vector.extract_strided_slice %16 {offsets = [0, 24], sizes = [8, 8], strides = [1, 1]} : vector<8x32xf32> to vector<8x8xf32>
    %66 = vector.extract_strided_slice %5 {offsets = [0, 24], sizes = [8, 8], strides = [1, 1]} : vector<8x64xf32> to vector<8x8xf32>
    %67 = vector.extract_strided_slice %5 {offsets = [0, 56], sizes = [8, 8], strides = [1, 1]} : vector<8x64xf32> to vector<8x8xf32>
    %cst_25 = arith.constant dense<0.000000e+00> : vector<8x8xf32>
    %68 = tpu.matmul %65, %66, %cst_25 {dimension_numbers = #tpu.dot_dimension_numbers<[1], [1], [0], [0], [0, 0, 1, 0], [], []>} : vector<8x8xf32>, vector<8x8xf32>, vector<8x8xf32> -> vector<8x8xf32>
    %69 = arith.addf %68, %11 : vector<8x8xf32>
    %cst_26 = arith.constant dense<0xFF800000> : vector<8xf32>
    %70 = vector.multi_reduction <maximumf>, %69, %cst_26 [1] : vector<8x8xf32> to vector<8xf32>
    %71 = vector.shape_cast %70 : vector<8xf32> to vector<8x1xf32>
    %72 = vector.broadcast %71 : vector<8x1xf32> to vector<8x8xf32>
    %73 = arith.subf %69, %72 : vector<8x8xf32>
    %74 = math.exp %73 : vector<8x8xf32>
    %cst_27 = arith.constant dense<0.000000e+00> : vector<8xf32>
    %75 = vector.multi_reduction <add>, %74, %cst_27 [1] : vector<8x8xf32> to vector<8xf32>
    %76 = vector.shape_cast %75 : vector<8xf32> to vector<8x1xf32>
    %77 = tpu.reciprocal %76 {approx = true} : vector<8x1xf32> -> vector<8x1xf32>
    %78 = vector.broadcast %77 : vector<8x1xf32> to vector<8x8xf32>
    %79 = arith.mulf %74, %78 : vector<8x8xf32>
    %cst_28 = arith.constant dense<0.000000e+00> : vector<8x8xf32>
    %80 = tpu.matmul %79, %67, %cst_28 {dimension_numbers = #tpu.dot_dimension_numbers<[1], [0], [0], [1], [0, 0, 1, 1], [], []>} : vector<8x8xf32>, vector<8x8xf32>, vector<8x8xf32> -> vector<8x8xf32>
    %81 = tpu.concatenate %32, %48, %64, %80 in 1 : vector<8x8xf32>, vector<8x8xf32>, vector<8x8xf32>, vector<8x8xf32> -> vector<8x32xf32>
    %c0_29 = arith.constant 0 : index
    %c0_30 = arith.constant 0 : index
    %82 = vector.load %arg9[%c0_29, %c0_30] : memref<32x32xf32, #tpu.memory_space<vmem>>, vector<32x32xf32>
    %cst_31 = arith.constant dense<0.000000e+00> : vector<8x32xf32>
    %83 = tpu.matmul %81, %82, %cst_31 {dimension_numbers = #tpu.dot_dimension_numbers<[1], [0], [0], [1], [0, 0, 1, 1], [], []>} : vector<8x32xf32>, vector<32x32xf32>, vector<8x32xf32> -> vector<8x32xf32>
    %c0_32 = arith.constant 0 : index
    %c0_33 = arith.constant 0 : index
    %84 = vector.load %arg10[%c0_32, %c0_33] : memref<1x32xf32, #tpu.memory_space<vmem>>, vector<1x32xf32>
    %85 = vector.broadcast %84 : vector<1x32xf32> to vector<8x32xf32>
    %86 = arith.addf %83, %85 : vector<8x32xf32>
    %87 = arith.addf %1, %86 : vector<8x32xf32>
    %c0_34 = arith.constant 0 : index
    %c0_35 = arith.constant 0 : index
    %88 = vector.load %arg11[%c0_34, %c0_35] : memref<1x32xf32, #tpu.memory_space<vmem>>, vector<1x32xf32>
    %c0_36 = arith.constant 0 : index
    %c0_37 = arith.constant 0 : index
    %89 = vector.load %arg12[%c0_36, %c0_37] : memref<1x32xf32, #tpu.memory_space<vmem>>, vector<1x32xf32>
    %cst_38 = arith.constant dense<0.000000e+00> : vector<8xf32>
    %90 = vector.multi_reduction <add>, %87, %cst_38 [1] : vector<8x32xf32> to vector<8xf32>
    %91 = vector.shape_cast %90 : vector<8xf32> to vector<8x1xf32>
    %cst_39 = arith.constant 3.200000e+01 : f32
    %92 = vector.broadcast %cst_39 : f32 to vector<8x1xf32>
    %93 = arith.divf %91, %92 : vector<8x1xf32>
    %94 = arith.mulf %87, %87 : vector<8x32xf32>
    %cst_40 = arith.constant dense<0.000000e+00> : vector<8xf32>
    %95 = vector.multi_reduction <add>, %94, %cst_40 [1] : vector<8x32xf32> to vector<8xf32>
    %96 = vector.shape_cast %95 : vector<8xf32> to vector<8x1xf32>
    %cst_41 = arith.constant 3.200000e+01 : f32
    %97 = vector.broadcast %cst_41 : f32 to vector<8x1xf32>
    %98 = arith.divf %96, %97 : vector<8x1xf32>
    %99 = arith.mulf %93, %93 : vector<8x1xf32>
    %100 = arith.subf %98, %99 : vector<8x1xf32>
    %cst_42 = arith.constant 0.000000e+00 : f32
    %101 = vector.broadcast %cst_42 : f32 to vector<8x1xf32>
    %102 = arith.maximumf %100, %101 : vector<8x1xf32>
    %103 = vector.broadcast %93 : vector<8x1xf32> to vector<8x32xf32>
    %104 = arith.subf %87, %103 : vector<8x32xf32>
    %cst_43 = arith.constant 9.99999997E-7 : f32
    %105 = vector.broadcast %cst_43 : f32 to vector<8x1xf32>
    %106 = arith.addf %102, %105 : vector<8x1xf32>
    %107 = math.rsqrt %106 : vector<8x1xf32>
    %108 = vector.broadcast %107 : vector<8x1xf32> to vector<8x32xf32>
    %109 = arith.mulf %104, %108 : vector<8x32xf32>
    %110 = vector.broadcast %88 : vector<1x32xf32> to vector<8x32xf32>
    %111 = arith.mulf %109, %110 : vector<8x32xf32>
    %112 = vector.broadcast %89 : vector<1x32xf32> to vector<8x32xf32>
    %113 = arith.addf %111, %112 : vector<8x32xf32>
    %c0_44 = arith.constant 0 : index
    %c0_45 = arith.constant 0 : index
    %114 = vector.load %arg13[%c0_44, %c0_45] : memref<32x64xf32, #tpu.memory_space<vmem>>, vector<32x64xf32>
    %cst_46 = arith.constant dense<0.000000e+00> : vector<8x64xf32>
    %115 = tpu.matmul %113, %114, %cst_46 {dimension_numbers = #tpu.dot_dimension_numbers<[1], [0], [0], [1], [0, 0, 1, 1], [], []>} : vector<8x32xf32>, vector<32x64xf32>, vector<8x64xf32> -> vector<8x64xf32>
    %c0_47 = arith.constant 0 : index
    %c0_48 = arith.constant 0 : index
    %116 = vector.load %arg14[%c0_47, %c0_48] : memref<1x64xf32, #tpu.memory_space<vmem>>, vector<1x64xf32>
    %117 = vector.broadcast %116 : vector<1x64xf32> to vector<8x64xf32>
    %118 = arith.addf %115, %117 : vector<8x64xf32>
    %cst_49 = arith.constant 0.000000e+00 : f32
    %119 = vector.broadcast %cst_49 : f32 to vector<8x64xf32>
    %120 = arith.maximumf %118, %119 : vector<8x64xf32>
    %c0_50 = arith.constant 0 : index
    %c0_51 = arith.constant 0 : index
    %121 = vector.load %arg15[%c0_50, %c0_51] : memref<64x32xf32, #tpu.memory_space<vmem>>, vector<64x32xf32>
    %cst_52 = arith.constant dense<0.000000e+00> : vector<8x32xf32>
    %122 = tpu.matmul %120, %121, %cst_52 {dimension_numbers = #tpu.dot_dimension_numbers<[1], [0], [0], [1], [0, 0, 1, 1], [], []>} : vector<8x64xf32>, vector<64x32xf32>, vector<8x32xf32> -> vector<8x32xf32>
    %c0_53 = arith.constant 0 : index
    %c0_54 = arith.constant 0 : index
    %123 = vector.load %arg16[%c0_53, %c0_54] : memref<1x32xf32, #tpu.memory_space<vmem>>, vector<1x32xf32>
    %124 = vector.broadcast %123 : vector<1x32xf32> to vector<8x32xf32>
    %125 = arith.addf %122, %124 : vector<8x32xf32>
    %126 = arith.addf %113, %125 : vector<8x32xf32>
    %c0_55 = arith.constant 0 : index
    %c0_56 = arith.constant 0 : index
    %127 = vector.load %arg17[%c0_55, %c0_56] : memref<1x32xf32, #tpu.memory_space<vmem>>, vector<1x32xf32>
    %c0_57 = arith.constant 0 : index
    %c0_58 = arith.constant 0 : index
    %128 = vector.load %arg18[%c0_57, %c0_58] : memref<1x32xf32, #tpu.memory_space<vmem>>, vector<1x32xf32>
    %cst_59 = arith.constant dense<0.000000e+00> : vector<8xf32>
    %129 = vector.multi_reduction <add>, %126, %cst_59 [1] : vector<8x32xf32> to vector<8xf32>
    %130 = vector.shape_cast %129 : vector<8xf32> to vector<8x1xf32>
    %cst_60 = arith.constant 3.200000e+01 : f32
    %131 = vector.broadcast %cst_60 : f32 to vector<8x1xf32>
    %132 = arith.divf %130, %131 : vector<8x1xf32>
    %133 = arith.mulf %126, %126 : vector<8x32xf32>
    %cst_61 = arith.constant dense<0.000000e+00> : vector<8xf32>
    %134 = vector.multi_reduction <add>, %133, %cst_61 [1] : vector<8x32xf32> to vector<8xf32>
    %135 = vector.shape_cast %134 : vector<8xf32> to vector<8x1xf32>
    %cst_62 = arith.constant 3.200000e+01 : f32
    %136 = vector.broadcast %cst_62 : f32 to vector<8x1xf32>
    %137 = arith.divf %135, %136 : vector<8x1xf32>
    %138 = arith.mulf %132, %132 : vector<8x1xf32>
    %139 = arith.subf %137, %138 : vector<8x1xf32>
    %cst_63 = arith.constant 0.000000e+00 : f32
    %140 = vector.broadcast %cst_63 : f32 to vector<8x1xf32>
    %141 = arith.maximumf %139, %140 : vector<8x1xf32>
    %142 = vector.broadcast %132 : vector<8x1xf32> to vector<8x32xf32>
    %143 = arith.subf %126, %142 : vector<8x32xf32>
    %cst_64 = arith.constant 9.99999997E-7 : f32
    %144 = vector.broadcast %cst_64 : f32 to vector<8x1xf32>
    %145 = arith.addf %141, %144 : vector<8x1xf32>
    %146 = math.rsqrt %145 : vector<8x1xf32>
    %147 = vector.broadcast %146 : vector<8x1xf32> to vector<8x32xf32>
    %148 = arith.mulf %143, %147 : vector<8x32xf32>
    %149 = vector.broadcast %127 : vector<1x32xf32> to vector<8x32xf32>
    %150 = arith.mulf %148, %149 : vector<8x32xf32>
    %151 = vector.broadcast %128 : vector<1x32xf32> to vector<8x32xf32>
    %152 = arith.addf %150, %151 : vector<8x32xf32>
    %c0_65 = arith.constant 0 : index
    %c0_66 = arith.constant 0 : index
    %c0_67 = arith.constant 0 : index
    %153 = vector.load %arg19[%c0_65, %c0_66, %c0_67] : memref<1x8x32xf32, #tpu.memory_space<vmem>>, vector<1x8x32xf32>
    %154 = vector.shape_cast %153 : vector<1x8x32xf32> to vector<8x32xf32>
    %155 = vector.shape_cast %152 : vector<8x32xf32> to vector<1x8x32xf32>
    tpu.vector_store %arg19[%c0_65, %c0_66, %c0_67], %155 {strides = array<i32>} : memref<1x8x32xf32, #tpu.memory_space<vmem>>, vector<1x8x32xf32>,
    return
  }
  func.func @transform_0(%arg0: i32, %arg1: i32) -> (i32, i32, i32) {
    %c0_i32 = arith.constant 0 : i32
    %c0_i32_0 = arith.constant 0 : i32
    return %arg0, %arg1, %c0_i32 : i32, i32, i32
  }
  func.func @transform_1(%arg0: i32, %arg1: i32) -> (i32, i32, i32) {
    %c0_i32 = arith.constant 0 : i32
    %c0_i32_0 = arith.constant 0 : i32
    %c0_i32_1 = arith.constant 0 : i32
    return %arg0, %c0_i32, %c0_i32_0 : i32, i32, i32
  }
  func.func @transform_2(%arg0: i32, %arg1: i32) -> (i32, i32, i32) {
    %c0_i32 = arith.constant 0 : i32
    %c0_i32_0 = arith.constant 0 : i32
    %c0_i32_1 = arith.constant 0 : i32
    return %arg0, %c0_i32, %c0_i32_0 : i32, i32, i32
  }
  func.func @transform_3(%arg0: i32, %arg1: i32) -> (i32, i32) {
    %c0_i32 = arith.constant 0 : i32
    %c0_i32_0 = arith.constant 0 : i32
    %c0_i32_1 = arith.constant 0 : i32
    return %c0_i32, %c0_i32_0 : i32, i32
  }
  func.func @transform_4(%arg0: i32, %arg1: i32) -> (i32, i32) {
    %c0_i32 = arith.constant 0 : i32
    %c0_i32_0 = arith.constant 0 : i32
    %c0_i32_1 = arith.constant 0 : i32
    return %c0_i32, %c0_i32_0 : i32, i32
  }
  func.func @transform_5(%arg0: i32, %arg1: i32) -> (i32, i32) {
    %c0_i32 = arith.constant 0 : i32
    %c0_i32_0 = arith.constant 0 : i32
    %c0_i32_1 = arith.constant 0 : i32
    return %c0_i32, %c0_i32_0 : i32, i32
  }
  func.func @transform_6(%arg0: i32, %arg1: i32) -> (i32, i32) {
    %c0_i32 = arith.constant 0 : i32
    %c0_i32_0 = arith.constant 0 : i32
    %c0_i32_1 = arith.constant 0 : i32
    return %c0_i32, %c0_i32_0 : i32, i32
  }
  func.func @transform_7(%arg0: i32, %arg1: i32) -> (i32, i32) {
    %c0_i32 = arith.constant 0 : i32
    %c0_i32_0 = arith.constant 0 : i32
    %c0_i32_1 = arith.constant 0 : i32
    return %c0_i32, %c0_i32_0 : i32, i32
  }
  func.func @transform_8(%arg0: i32, %arg1: i32) -> (i32, i32) {
    %c0_i32 = arith.constant 0 : i32
    %c0_i32_0 = arith.constant 0 : i32
    %c0_i32_1 = arith.constant 0 : i32
    return %c0_i32, %c0_i32_0 : i32, i32
  }
  func.func @transform_9(%arg0: i32, %arg1: i32) -> (i32, i32) {
    %c0_i32 = arith.constant 0 : i32
    %c0_i32_0 = arith.constant 0 : i32
    %c0_i32_1 = arith.constant 0 : i32
    return %c0_i32, %c0_i32_0 : i32, i32
  }
  func.func @transform_10(%arg0: i32, %arg1: i32) -> (i32, i32) {
    %c0_i32 = arith.constant 0 : i32
    %c0_i32_0 = arith.constant 0 : i32
    %c0_i32_1 = arith.constant 0 : i32
    return %c0_i32, %c0_i32_0 : i32, i32
  }
  func.func @transform_11(%arg0: i32, %arg1: i32) -> (i32, i32) {
    %c0_i32 = arith.constant 0 : i32
    %c0_i32_0 = arith.constant 0 : i32
    %c0_i32_1 = arith.constant 0 : i32
    return %c0_i32, %c0_i32_0 : i32, i32
  }
  func.func @transform_12(%arg0: i32, %arg1: i32) -> (i32, i32) {
    %c0_i32 = arith.constant 0 : i32
    %c0_i32_0 = arith.constant 0 : i32
    %c0_i32_1 = arith.constant 0 : i32
    return %c0_i32, %c0_i32_0 : i32, i32
  }
  func.func @transform_13(%arg0: i32, %arg1: i32) -> (i32, i32) {
    %c0_i32 = arith.constant 0 : i32
    %c0_i32_0 = arith.constant 0 : i32
    %c0_i32_1 = arith.constant 0 : i32
    return %c0_i32, %c0_i32_0 : i32, i32
  }
  func.func @transform_14(%arg0: i32, %arg1: i32) -> (i32, i32) {
    %c0_i32 = arith.constant 0 : i32
    %c0_i32_0 = arith.constant 0 : i32
    %c0_i32_1 = arith.constant 0 : i32
    return %c0_i32, %c0_i32_0 : i32, i32
  }
  func.func @transform_15(%arg0: i32, %arg1: i32) -> (i32, i32) {
    %c0_i32 = arith.constant 0 : i32
    %c0_i32_0 = arith.constant 0 : i32
    %c0_i32_1 = arith.constant 0 : i32
    return %c0_i32, %c0_i32_0 : i32, i32
  }
  func.func @transform_16(%arg0: i32, %arg1: i32) -> (i32, i32) {
    %c0_i32 = arith.constant 0 : i32
    %c0_i32_0 = arith.constant 0 : i32
    %c0_i32_1 = arith.constant 0 : i32
    return %c0_i32, %c0_i32_0 : i32, i32
  }
  func.func @transform_17(%arg0: i32, %arg1: i32) -> (i32, i32, i32) {
    %c0_i32 = arith.constant 0 : i32
    %c0_i32_0 = arith.constant 0 : i32
    return %arg0, %arg1, %c0_i32 : i32, i32, i32
  }
}

</mosaic_0001>

<bundles_post_ra>
// kernel: tpu_custom_call.1
= control target key start
LH: loop header
LB: loop body
LE: loop exit
PB: predicated region body
PF: predicated region fallthrough
CT: control target
= control target key end

     0   :  { %s3038_s0 = inlined_call_operand.hbm [shape: f32[2,8,32], index: 0, kind: input, shape index: {}]   ;;  %s3039_s1 = inlined_call_operand.hbm [shape: f32[2,8,32], index: 1, kind: input, shape index: {}]   ;;  %s3040_s2 = inlined_call_operand.vmem [shape: f32[2,1,8], index: 2, kind: input, shape index: {}]   ;;  %s3041_s3 = inlined_call_operand.vmem [shape: f32[32,32], index: 3, kind: input, shape index: {}]   ;;  %s3042_s4 = inlined_call_operand.vmem [shape: f32[1,32], index: 4, kind: input, shape index: {}]   ;;  %s3043_s5 = inlined_call_operand.vmem [shape: f32[32,64], index: 5, kind: input, shape index: {}]   ;;  %s3044_s6 = inlined_call_operand.vmem [shape: f32[1,64], index: 6, kind: input, shape index: {}]   ;;  %s3045_s7 = inlined_call_operand.vmem [shape: f32[32,32], index: 7, kind: input, shape index: {}]   ;;  %s3046_s8 = inlined_call_operand.vmem [shape: f32[1,32], index: 8, kind: input, shape index: {}]   ;;  %s3047_s9 = inlined_call_operand.vmem [shape: f32[1,32], index: 9, kind: input, shape index: {}]   ;;  %s3048_s10 = inlined_call_operand.vmem [shape: f32[1,32], index: 10, kind: input, shape index: {}]   ;;  %s3049_s11 = inlined_call_operand.hbm [shape: f32[32,64], index: 11, kind: input, shape index: {}]   ;;  %s3050_s12 = inlined_call_operand.vmem [shape: f32[1,64], index: 12, kind: input, shape index: {}]   ;;  %s3051_s13 = inlined_call_operand.vmem [shape: f32[64,32], index: 13, kind: input, shape index: {}]   ;;  %s3052_s14 = inlined_call_operand.vmem [shape: f32[1,32], index: 14, kind: input, shape index: {}]   ;;  %s3053_s15 = inlined_call_operand.vmem [shape: f32[1,32], index: 15, kind: input, shape index: {}]   ;;  %s3054_s16 = inlined_call_operand.vmem [shape: f32[1,32], index: 16, kind: input, shape index: {}]   ;;  %s3055_s17 = inlined_call_operand.hbm [shape: f32[2,8,32], index: 17, kind: output, shape index: {}]  }
   0x1   :  { %3071 = sst [smem:[#allocation21_spill]] %s3038_s0 }
   0x2   :  { %3072 = sst [smem:[#allocation22_spill]] %s3039_s1 }
   0x3   :  { %3073 = sst [smem:[#allocation23_spill]] %s3047_s9 }
   0x4   :  { %3074 = sst [smem:[#allocation24_spill]] %s3048_s10 }
   0x5   :  { %3075 = sst [smem:[#allocation25_spill]] %s3049_s11 }
   0x6   :  { %3076 = sst [smem:[#allocation26_spill]] %s3050_s12 }
   0x7   :  { %3077 = sst [smem:[#allocation27_spill]] %s3051_s13 }
   0x8   :  { %3078 = sst [smem:[#allocation28_spill]] %s3052_s14 }
   0x9   :  { %3079 = sst [smem:[#allocation29_spill]] %s3053_s15 }
   0xa   :  { %3080 = sst [smem:[#allocation30_spill]] %s3054_s16 }
   0xb   :  { %3081 = sst [smem:[#allocation31_spill]] %s3055_s17 }
   0xc   :  { %22 = vsyncpa [#allocation4], 0 }
   0xd   :  { %24 = vsyncpa [#allocation4 + $0x1], 0 }
   0xe   :  { %25 = vsyncpa [#allocation7], 0 }
   0xf   :  { %27 = vsyncpa [#allocation7 + $0x1], 0 }
  0x10   :  { %28 = vsyncpa [#allocation5], 0 }
  0x11   :  { %30 = vsyncpa [#allocation5 + $0x1], 0  ;;  %s2601_s24 = smov 0   ;;  %s2603_s25 = smov 0  }
  0x12   :  { %s2605_s26 = smov 0   ;;  %s2607_s27 = smov 0  }
  0x13   :  { %s2609_s28 = smov 0   ;;  %s2611_s29 = smov 0  }
  0x14 LB: > { %3082 = sst [smem:[#allocation14_spill]] %s2470_s24  ;;  %s2632_s0 = sadd.s32 4294967295, %s2490_s29   ;;  %s2490_s29 = sphi %s2611_s29, %s36_s29   ;;  %s2486_s28 = sphi %s2609_s28, %s3121_s28   ;;  %s2482_s27 = sphi %s2607_s27, %s3120_s27   ;;  %s2478_s26 = sphi %s2605_s26, %s3119_s26   ;;  %s2474_s25 = sphi %s2603_s25, %s3123_s25   ;;  %s2470_s24 = sphi %s2601_s24, %s3122_s24  }
  0x15   : > { %3083 = sst [smem:[#allocation15_spill]] %s2478_s26  ;;  %s1972_s30 = sadd.s32 4294967294, %s2490_s29  }
  0x16   : > { %3084 = sst [smem:[#allocation16_spill]] %s2486_s28  ;;  %p70_p0 = scmp.ne.s32.totalorder %s2474_s25, %s2470_s24 }
  0x17   : > { %p3061_p1 = scmp.eq.s32.totalorder %s2632_s0, 0  ;;  %p448_p3 = scmp.eq.s32.totalorder %s1972_s30, 1 }
  0x18   : > { %p1973_p5 = scmp.ge.s32.totalorder %s2490_s29, 1  ;;  %p455_p7 = scmp.lt.s32.totalorder %s2490_s29, 3 }
  0x19   : > { %p2641_p4 = por %p3061_p1, %p70_p0  ;;  %p2646_p6 = por %p448_p3, %p70_p0 }
  0x1a   : > { %p2651_p8 = pnand %p1973_p5, %p455_p7  ;;  %s2492_s20 = smov [#allocation8]  }
  0x1b   : > { %s3085_s18 = scalar_select %p2641_p4, 1, 0 }
  0x1c   : > { %s3086_s19 = scalar_select %p2646_p6, 1, 0 }
  0x1d   : > { %s3088_s1 = scalar_select %p2651_p8, 1, 0 }
  0x1e   : > { %3087 = sst [smem:[#allocation17_spill]] %s3086_s19  ;;  %s491_s21 = sshll.u32 %s2492_s20, 4  ;;  %s492_s21 = int_to_ptr.vmem [resolvable:$true] %s491_s21 }
  0x1f   : > { %p2209_p9 = pneg %p2651_p8  ;;  %s48_s23 = sadd.s32 1, %s2486_s28 }
  0x20   : > { %s3090_s11 = sld [smem:[#allocation25_spill]] }
  0x21   : > { %p2660_p11 = pnand %p2209_p9, %p3061_p1 }
  0x23   : > { %p2314_p13 = pneg %p2660_p11 }
  0x26   : > { %s2312_s24 = scalar_lea.hbm %s3090_s11, 512 }
  0x27   : > { %p2313_p12 = scmp.ne.s32.totalorder %s3090_s11, %s2312_s24  ;;  %p2319_p5 = scmp.lt.u32.totalorder %s2312_s24, %s3090_s11 }
  0x29   : > { %p2315_p0 = pnand %p2314_p13, %p2313_p12 }
  0x2b   : > { %p2316_p3 = pneg %p2315_p0 }
  0x2d   : > { %p2321_p7 = pnand %p2319_p5, %p2316_p3 }
  0x2f   : > { %2324 = shalt.err (!%p2321_p7)
}
  0x30   : > { %s2325_s14 = scalar_lea.vmem %s492_s21, 512  ;;  %p2333_p2 = scmp.lt.s32.totalorder %s492_s21, %s492_s21 }
  0x31   : > { %p2326_p9 = scmp.ne.s32.totalorder %s492_s21, %s2325_s14  ;;  %p2334_p6 = scmp.lt.s32.totalorder %s2325_s14, %s2325_s14 }
  0x33   : > { %p2328_p10 = pnand %p2326_p9, %p2314_p13  ;;  %p2335_p4 = por %p2334_p6, %p2333_p2 }
  0x35   : > { %p2329_p1 = pneg %p2328_p10 }
  0x37   : > { %p2336_p8 = pnand %p2335_p4, %p2329_p1 }
  0x39   : > { %2339 = shalt.err (!%p2336_p8)
}
  0x3a   : > { %s2493_s16 = smov 128   ;;  %s2494_s15 = smov 8  }
  0x3b   : > { %2212 = dma.hbm_to_vmem [thread:$0]  (!%p2660_p11), %s3090_s11, 512, %s492_s21, [#allocation7], %s2493_s16, %s2493_s16, %s2494_s15  }
  0x3c   : > { %p50_p1 = scmp.ge.s32.totalorder %s48_s23, 2  ;;  %s57_s14 = sadd.s32 1, %s2478_s26 }
  0x3d   : > { %p64_p2 = scmp.ne.s32.totalorder %s2478_s26, %s2474_s25  ;;  %p65_p4 = scmp.eq.s32.totalorder %s2490_s29, 0 }
  0x3e   : > { %s3125_s23 = smov (%p50_p1, %s48_s23), 0  ;;  %p3093_p8 = scmp.eq.s32.totalorder %s2632_s0, 1 }
  0x3f   : > { %3091 = sst [smem:[#allocation18_spill]] %s3125_s23  ;;  %p2687_p6 = por %p65_p4, %p64_p2 }
  0x40   : > { %p2693_p10 = por %p3093_p8, %p64_p2  ;;  %s52_s30 = ssub.s32 %s2486_s28, %s3125_s23 }
  0x41   : > { %p2225_p11 = scmp.lt.s32.totalorder %s2490_s29, 2  ;;  %p55_p12 = scmp.eq.s32.totalorder %s52_s30, 0 }
  0x42   : > { %s3094_s22 = scalar_select %p2693_p10, 1, 0 }
  0x43   : > { %s520_s21 = sand.u32 1, %s2478_s26   ;;  %s1977_s15 = sshll.u32 %s2486_s28, 7 }
  0x44   : > { %3095 = sst [smem:[#allocation19_spill]] %s3094_s22  ;;  %s2701_s20 = sshll.u32 %s520_s21, 3 }
  0x45   : > { %s2704_s16 = scalar_select %p55_p12, %s2478_s26, %s57_s14  }
  0x46   : > { %s3097_s11 = sld [smem:[#allocation21_spill]]  ;;  %s524_s10 = scalar_lea.vmem [#allocation3], %s2701_s20 }
  0x47   : > { %3096 = sst [smem:[#allocation20_spill]] %s2704_s16  ;;  %s532_s23 = sshll.u32 %s524_s10, 4  ;;  %s2713_s23 = int_to_ptr.vmem [resolvable:$true] %s532_s23 }
  0x48   : > { %p2717_p13 = pnand %p2225_p11, %p2687_p6  ;;  %s3099_s16 = sld [smem:[#allocation22_spill]] }
  0x49   : > { %s539_s24 = sand.u32 1, %s2490_s29   ;;  %s521_s26 = scalar_lea.sflag [#allocation4], %s520_s21 }
  0x4a   : > { %p2342_p3 = pneg %p2717_p13 }
  0x4c   : > { %s2710_s12 = scalar_lea.hbm %s3097_s11, %s1977_s15  ;;  %s2345_s9 = scalar_lea.hbm %s3097_s11, 256 }
  0x4d   : > { %s2340_s22 = scalar_lea.hbm %s2710_s12, 128  ;;  %p2346_p9 = scmp.lt.u32.totalorder %s2710_s12, %s3097_s11 }
  0x4e   : > { %s2724_s17 = scalar_lea.hbm %s3099_s16, %s1977_s15  ;;  %p2341_p0 = scmp.ne.s32.totalorder %s2710_s12, %s2340_s22 }
  0x4f   : > { %p2347_p1 = scmp.lt.u32.totalorder %s2345_s9, %s2340_s22  ;;  %p2349_p4 = scmp.lt.u32.totalorder %s2340_s22, %s2710_s12 }
  0x50   : > { %p2343_p5 = pnand %p2342_p3, %p2341_p0 }
  0x51   : > { %p2348_p2 = por %p2347_p1, %p2346_p9 }
  0x52   : > { %p2344_p7 = pneg %p2343_p5 }
  0x53   : > { %p2350_p6 = por %p2349_p4, %p2348_p2 }
  0x55   : > { %p2351_p8 = pnand %p2350_p6, %p2344_p7 }
  0x57   : > { %2354 = shalt.err (!%p2351_p8)
}
  0x58   : > { %s2355_s21 = scalar_lea.vmem %s2713_s23, 128  ;;  %s2495_s15 = smov [#allocation3]  }
  0x59   : > { %p2356_p11 = scmp.ne.s32.totalorder %s2713_s23, %s2355_s21  ;;  %s2360_s14 = sshll.u32 %s2495_s15, 4  ;;  %s2361_s14 = int_to_ptr.vmem [resolvable:$false] %s2360_s14 }
  0x5a   : > { %s2362_s13 = scalar_lea.vmem %s2361_s14, 256  ;;  %p2363_p5 = scmp.lt.s32.totalorder %s2713_s23, %s2361_s14 }
  0x5b   : > { %p2358_p12 = pnand %p2356_p11, %p2342_p3  ;;  %p2364_p9 = scmp.lt.s32.totalorder %s2362_s13, %s2355_s21 }
  0x5d   : > { %p2359_p0 = pneg %p2358_p12  ;;  %p2365_p1 = por %p2364_p9, %p2363_p5 }
  0x5f   : > { %p2366_p2 = pnand %p2365_p1, %p2359_p0 }
  0x61   : > { %2369 = shalt.err (!%p2366_p2)
}
  0x62   : > { %2216 = dma.hbm_to_vmem [thread:$0]  (!%p2717_p13), %s2710_s12, 128, %s2713_s23, %s521_s26  }
  0x63   : > { %s543_s9 = scalar_lea.vmem [#allocation6], %s2701_s20  ;;  %s540_s10 = scalar_lea.sflag [#allocation7], %s539_s24 }
  0x64   : > { %s550_s22 = sshll.u32 %s543_s9, 4  ;;  %s2370_s19 = scalar_lea.hbm %s2724_s17, 128  ;;  %s551_s22 = int_to_ptr.vmem [resolvable:$true] %s550_s22 }
  0x65   : > { %p2371_p7 = scmp.ne.s32.totalorder %s2724_s17, %s2370_s19  ;;  %s2375_s15 = scalar_lea.hbm %s3099_s16, 256 }
  0x66   : > { %p2376_p8 = scmp.lt.u32.totalorder %s2724_s17, %s3099_s16  ;;  %p2377_p11 = scmp.lt.u32.totalorder %s2375_s15, %s2370_s19 }
  0x67   : > { %p2373_p4 = pnand %p2371_p7, %p2342_p3  ;;  %p2379_p0 = scmp.lt.u32.totalorder %s2370_s19, %s2724_s17 }
  0x68   : > { %p2378_p12 = por %p2377_p11, %p2376_p8 }
  0x69   : > { %p2374_p6 = pneg %p2373_p4 }
  0x6a   : > { %p2380_p5 = por %p2379_p0, %p2378_p12 }
  0x6c   : > { %p2381_p9 = pnand %p2380_p5, %p2374_p6 }
  0x6e   : > { %2384 = shalt.err (!%p2381_p9)
}
  0x6f   : > { %s2385_s12 = scalar_lea.vmem %s551_s22, 128  ;;  %s2496_s26 = smov [#allocation6]  }
  0x70   : > { %p2386_p1 = scmp.ne.s32.totalorder %s551_s22, %s2385_s12  ;;  %s2390_s23 = sshll.u32 %s2496_s26, 4  ;;  %s2391_s23 = int_to_ptr.vmem [resolvable:$false] %s2390_s23 }
  0x71   : > { %s2392_s20 = scalar_lea.vmem %s2391_s23, 256  ;;  %p2393_p4 = scmp.lt.s32.totalorder %s551_s22, %s2391_s23 }
  0x72   : > { %p2388_p2 = pnand %p2386_p1, %p2342_p3  ;;  %p2394_p10 = scmp.lt.s32.totalorder %s2392_s20, %s2385_s12 }
  0x74   : > { %p2389_p7 = pneg %p2388_p2  ;;  %p2395_p8 = por %p2394_p10, %p2393_p4 }
  0x76   : > { %p2396_p11 = pnand %p2395_p8, %p2389_p7 }
  0x78   : > { %2399 = shalt.err (!%p2396_p11)
}
  0x79   : > { %2219 = dma.hbm_to_vmem [thread:$0]  (!%p2717_p13), %s2724_s17, 128, %s551_s22, %s540_s10  }
  0x7a   : > { %p3100_p6 = scmp.ne.s32.totalorder %s3088_s1, 0 }
  0x7b   : > { %s2777_s24 = sand.u32 (!%p3100_p6), 1, %s2474_s25   ;;  %p3101_p10 = scmp.ne.s32.totalorder (!%p3100_p6), %s3085_s18, 0 }
  0x7c   : > { %565 = sbr.rel (%p3100_p6) target bundleno = 2356 (0x934), region = 88  ;;  %s2780_s9 = sshll.u32 (!%p3100_p6), %s2777_s24, 3 }
  0x7d   : > { %s568_s19 = scalar_lea.sflag (!%p3100_p6), [#allocation4], %s2777_s24  ;;  %s571_s28 = scalar_lea.vmem (!%p3100_p6), [#allocation3], %s2780_s9 }
  0x83   : > { %2453 = dma.done.wait (%p3101_p10), %s568_s19, 128  }
  0x84   : > { %2455 = vsyncadd (%p3101_p10), %s568_s19, 4294967168  ;;  %s576_s1 = sand.u32 1, %s2632_s0   ;;  %s580_s17 = scalar_lea.vmem [#allocation6], %s2780_s9 }
  0x85   : > { %s577_s30 = scalar_lea.sflag [#allocation7], %s576_s1 }
  0x86   : > { %2457 = dma.done.wait (%p3101_p10), %s577_s30, 128  }
  0x87   : > { %2459 = vsyncadd (%p3101_p10), %s577_s30, 4294967168  ;;  %p3102_p13 = scmp.eq.s32.totalorder %s2632_s0, 0 }
  0x89   : > { %2461 = dma.done.wait (%p3102_p13), [#allocation7], 512   ;;  %p3103_p3 = pmov %p3102_p13 }
  0x8a   : > { %v2497_v0 = vmov 0.0|0.0   ;;  %vm2498_vm0 = vmmov 0   ;;  %v2499_v1 = vmov 0.0   ;;  %v652_v2 = vld [vmem:[%s3043_s5] sm:$0xff]  ;;  %v653_v3 = vld [vmem:[%s3043_s5 + $0x8] sm:$0xff]  ;;  %v654_v4 = vld [vmem:[%s3043_s5 + $0x10] sm:$0xff]  ;;  %v743_v31 = vlaneseq }
  0x8b   : > { %2463 = vsyncadd (%p3103_p3), [#allocation7], 4294966784  ;;  %2163 = vmatprep.subr.bf16.mxu1 %v2497_v0  ;;  %2068 = vmatprep.mubr.msk.f32.mxu1 %vm2498_vm0, %v2499_v1  ;;  %v2164_v5 = vpack.c.bf16 %v653_v3, %v652_v2  ;;  %v655_v6 = vld [vmem:[%s3043_s5 + $0x18] sm:$0xff]  ;;  %v748_v8 = vld [vmem:[%s3041_s3] sm:$0xff]  ;;  %vm663_vm1 = vcmask 261120   ;;  %vm737_vm2 = vcmask 523264  }
  0x8c   : > { %2082 = vmatprep.subr.mxu0 %v2499_v1  ;;  %2084 = vmatprep.mubr.msk.f32.mxu0 %vm2498_vm0, %v2499_v1  ;;  %v2167_v7 = vpack.c.bf16 %v655_v6, %v654_v4  ;;  %v749_v9 = vld [vmem:[%s3041_s3 + $0x8] sm:$0xff]  ;;  %v651_v10 = vld [vmem:[%s580_s17] sm:$0xff]  ;;  %v750_v12 = vld [vmem:[%s3041_s3 + $0x10] sm:$0xff]  ;;  %vm833_vm3 = vcmask 64512   ;;  %s2500_s0 = smov 112   ;;  %s2501_s21 = smov 120  }
  0x8d   : > { %2165 = vmatpush3.bf16.msra.mxu1 %v2164_v5  ;;  %v2170_v11 = vpack.c.bf16 %v749_v9, %v748_v8  ;;  %v751_v13 = vld [vmem:[%s3041_s3 + $0x18] sm:$0xff]  ;;  %v2836_v15 = vld [vmem:[%s571_s28] sm:$0xff]  ;;  %v1985_v16 = vld [vmem:[%s3044_s6] ss:$0 sm:$0xff]  ;;  %s2502_s15 = smov 104   ;;  %p643_p12 = scmp.lt.s32.totalorder %s2482_s27, 1 }
  0x8e   : > { %2166 = vmatprep.subr.bf16.mxu1 %v2497_v0  ;;  %v2173_v14 = vpack.c.bf16 %v751_v13, %v750_v12  ;;  %v1987_v20 = vld [vmem:[%s3042_s4] ss:$0 sm:$0xff]  ;;  %v744_v32 = vshrl.u32 %v743_v31, 7  ;;  %s2503_s23 = smov 96   ;;  %s2504_s20 = smov 80   ;;  %v1510_v31 = vld [vmem:[%s3045_s7 + $0x8] sm:$0xff] }
  0x8f   : > { %s644_s14 = scalar_select %p643_p12, %s2482_s27, 1  ;;  %vm1505_vm4 = vcmask 130048   ;;  %vm1507_vm5 = vcmask 195584  }
  0x90   : > { %v745_v35 = vsub.s32 0, %v744_v32  ;;  %s2505_s19 = smov 72   ;;  %s2506_s1 = smov 88  }
  0x91   : > { %2168 = vmatpush3.bf16.msra.mxu1 %v2167_v7  ;;  %s645_s26 = scalar_lea.vmem %s3040_s2, %s644_s14  ;;  %s2508_s14 = smov 16  }
  0x92   : > { %2169 = vmatprep.subr.bf16.mxu1 %v2497_v0  ;;  %v740_v33 = vld [vmem:[%s645_s26] sm:$0x1]  ;;  %s2509_s13 = smov 24   ;;  %s3105_s12 = sld [smem:[#allocation23_spill]] }
  0x93   : > { %v741_v34 = vmul.f32 -1e+09, %v740_v33  ;;  %v1511_v33 = vld [vmem:[%s3045_s7 + $0x10] sm:$0xff]  ;;  %s3107_s10 = sld [smem:[#allocation26_spill]]  ;;  %s3110_s26 = sld [smem:[#allocation29_spill]] }
  0x94   : > { %2069 = vmatmul.mubr.msk.f32.vlgmr.msra.gmra.mrb[0].mxu1 %vm663_vm1, %v651_v10  ;;  %s2012_s30 = sshll.u32 %s2482_s27, 7  ;;  %s642_s18 = scalar_lea.vmem [#allocation9], %s2780_s9 }
  0x95   : > { %2171 = vmatpush3.bf16.msra.mxu1 %v2170_v11  ;;  %2079 = vmatprep.mubr.msk.f32.mxu1 %vm2498_vm0, %v2499_v1  ;;  %v746_v36 = vrot.slane %v741_v34, %v745_v35  ;;  %v1512_v34 = vld [vmem:[%s3045_s7 + $0x18] sm:$0xff]  ;;  %s1850_s17 = sshll.u32 %s642_s18, 4  ;;  %s2510_s27 = smov [#allocation9]   ;;  %s2990_s17 = int_to_ptr.vmem [resolvable:$true] %s1850_s17 }
  0x96   : > { %2172 = vmatprep.subr.bf16.mxu1 %v2497_v0  ;;  %v2179_v35 = vpack.c.bf16 %v1512_v34, %v1511_v33  ;;  %s2404_s9 = sshll.u32 %s2510_s27, 4  ;;  %s2405_s9 = int_to_ptr.vmem [resolvable:$false] %s2404_s9 }
  0x97   : > { %p2407_p2 = scmp.lt.s32.totalorder %s2990_s17, %s2405_s9 }
  0x99   : > { %2174 = vmatpush3.bf16.msra.mxu1 %v2173_v14 }
  0x9a   : > { %2087 = vmatprep.subr.mxu1 %v2499_v1 }
  0x9c   : > { %2080 = vmatmul.mubr.msk.f32.vlgmr.msra.gmra.mrb[2].mxu1 %vm663_vm1, %v2836_v15 }
  0x9d   : > { %2089 = vmatprep.mubr.msk.f32.mxu1 %vm2498_vm0, %v2499_v1 }
 0x167   : > { %v733_v17 = vpop.f32.mrb[0].mxu1 }
 0x168   : > { %v734_v18 = vadd.f32 %v1985_v16, %v733_v17  ;;  %v2070_v19 = vpop.f32.mrb[1].mxu1 }
 0x16a   : > { %738 = vst.msk [vmem:[#allocation2] sm:$0xff] %vm737_vm2, %v734_v18 }
 0x16f   : > { %v829_v21 = vpop.f32.mrb[2].mxu1 }
 0x170   : > { %v2081_v22 = vpop.f32.mrb[3].mxu1  ;;  %v830_v24 = vadd.f32 %v1987_v20, %v829_v21 }
 0x171   : > { %v2850_v23 = vld [vmem:[#allocation2] sm:$0xff] }
 0x172   : > { %1164 = vrot.lane.b32.xlu1 %v2850_v23, %s2500_s0  ;;  %999 = vrot.lane.b32.xlu0 %v2850_v23, %s2501_s21 }
 0x173   : > { %2083 = vmatpush3.xpose.msk.msra.mxu0 %vm833_vm3, %v2850_v23 }
 0x174   : > { %2092 = vmatprep.subr.mxu0 %v2499_v1 }
 0x176   : > { %2085 = vmatmul.mubr.msk.f32.vlgmr.msra.gmra.mrb[0].mxu0 %vm833_vm3, %v830_v24  ;;  %1162 = vrot.lane.b32.xlu1 %v830_v24, %s2500_s0 }
 0x177   : > { %997 = vrot.lane.b32.xlu0 %v830_v24, %s2501_s21  ;;  %2094 = vmatprep.mubr.msk.f32.mxu0 %vm2498_vm0, %v2499_v1  ;;  %s1836_s21 = scalar_lea.sflag [#allocation5], %s2777_s24 }
 0x17a   : > { %1327 = vrot.lane.b32.xlu1 %v830_v24, %s2502_s15 }
 0x17b   : > { %1329 = vrot.lane.b32.xlu0 %v2850_v23, %s2502_s15  ;;  %s2507_s15 = smov 8  }
 0x1e4   : > { %v1000_v25 = vpop.permute.xlu0 %999  ;;  %v1165_v26 = vpop.permute.xlu1 %1164 }
 0x1e5   : > { %2093 = vmatpush3.xpose.msk.msra.mxu0 %vm833_vm3, %v1000_v25 }
 0x1e6   : > { %2102 = vmatprep.subr.mxu0 %v2499_v1 }
 0x1e8   : > { %v1163_v28 = vpop.permute.xlu1 %1162 }
 0x1e9   : > { %v998_v27 = vpop.permute.xlu0 %997 }
 0x1ea   : > { %2095 = vmatmul.mubr.msk.f32.vlgmr.msra.gmra.mrb[2].mxu0 %vm833_vm3, %v998_v27 }
 0x1eb   : > { %2103 = vmatpush3.xpose.msk.msra.mxu0 %vm833_vm3, %v1165_v26  ;;  %2104 = vmatprep.mubr.msk.f32.mxu0 %vm2498_vm0, %v2499_v1 }
 0x1ec   : > { %2112 = vmatprep.subr.mxu0 %v2499_v1  ;;  %v1328_v30 = vpop.permute.xlu1 %1327 }
 0x1ed   : > { %v1330_v29 = vpop.permute.xlu0 %1329 }
 0x1ee   : > { %2105 = vmatmul.mubr.msk.f32.vlgmr.msra.gmra.mrb[4].mxu0 %vm833_vm3, %v1163_v28 }
 0x1ef   : > { %2113 = vmatpush3.xpose.msk.msra.mxu0 %vm833_vm3, %v1330_v29  ;;  %2114 = vmatprep.mubr.msk.f32.mxu0 %vm2498_vm0, %v2499_v1 }
 0x1f0   : > { %2175 = vmatprep.subr.bf16.mxu0 %v2497_v0 }
 0x1f2   : > { %2115 = vmatmul.mubr.msk.f32.vlgmr.msra.gmra.mrb[6].mxu0 %vm833_vm3, %v1328_v30  ;;  %v1509_v30 = vld [vmem:[%s3045_s7] sm:$0xff] }
 0x1f3   : > { %2130 = vmatprep.mubr.msk.f32.mxu0 %vm2498_vm0, %v2499_v1  ;;  %v2176_v32 = vpack.c.bf16 %v1510_v31, %v1509_v30 }
 0x1f5   : > { %2177 = vmatpush3.bf16.msra.mxu0 %v2176_v32 }
 0x1f6   : > { %2178 = vmatprep.subr.bf16.mxu0 %v2497_v0 }
 0x1f9   : > { %2180 = vmatpush3.bf16.msra.mxu0 %v2179_v35 }
 0x1fa   : > { %2187 = vmatprep.subr.bf16.mxu0 %v2497_v0 }
 0x249   : > { %v906_v37 = vpop.f32.mrb[0].mxu0 }
 0x24a   : > { %v907_v38 = vadd.f32 %v906_v37, %v746_v36  ;;  %v2086_v39 = vpop.f32.mrb[1].mxu0 }
 0x24c   : > { %v910_v40 = vsel %vm833_vm3, %v907_v38, -inf }
 0x24d   : > { %911 = vmax.xlane.f32.xlu0 %v910_v40 }
 0x2bd   : > { %v1071_v41 = vpop.f32.mrb[2].mxu0 }
 0x2be   : > { %v1072_v42 = vadd.f32 %v1071_v41, %v746_v36  ;;  %v2096_v43 = vpop.f32.mrb[3].mxu0 }
 0x2c0   : > { %v1075_v44 = vsel %vm833_vm3, %v1072_v42, -inf }
 0x2c1   : > { %1076 = vmax.xlane.f32.xlu1 %v1075_v44  ;;  %v1236_v45 = vpop.f32.mrb[4].mxu0 }
 0x2c2   : > { %v1237_v46 = vadd.f32 %v1236_v45, %v746_v36  ;;  %v2106_v47 = vpop.f32.mrb[5].mxu0 }
 0x2c4   : > { %v1240_v48 = vsel %vm833_vm3, %v1237_v46, -inf }
 0x2c5   : > { %1241 = vmax.xlane.f32.xlu0 %v1240_v48  ;;  %v1401_v49 = vpop.f32.mrb[6].mxu0  ;;  %v2001_v48 = vld [vmem:[%s3046_s8] ss:$0 sm:$0xff] }
 0x2c6   : > { %v1402_v50 = vadd.f32 %v1401_v49, %v746_v36  ;;  %v2116_v51 = vpop.f32.mrb[7].mxu0 }
 0x2c8   : > { %v1405_v52 = vsel %vm833_vm3, %v1402_v50, -inf }
 0x2c9   : > { %1406 = vmax.xlane.f32.xlu0 %v1405_v52 }
 0x2d2   : > { %921 = vrot.lane.b32.xlu1 %v2850_v23, %s2503_s23 }
 0x2da   : > { %v912_v53 = vpop.xlane.xlu0 %911 }
 0x2db   : > { %v913_v54 = vsub.f32 %v907_v38, %v912_v53 }
 0x2dd   : > { %v914_v55 = vmul.f32 1.442695, %v913_v54 }
 0x2df   : > { %2292 = vpow2.f32 %v914_v55 }
 0x2e9   : > { %v2293_v56 = vpop.eup %2292 }
 0x2ea   : > { %v916_v57 = vsel %vm833_vm3, %v2293_v56, 0.0 }
 0x2f6   : > { %917 = vadd.xlane.f32.xlu1 %v916_v57  ;;  %v1628_v57 = vld [vmem:[#allocation8 + $0x8] sm:$0xff] }
 0x34e   : > { %v1077_v58 = vpop.xlane.xlu1 %1076 }
 0x34f   : > { %v1078_v59 = vsub.f32 %v1072_v42, %v1077_v58 }
 0x351   : > { %v1079_v60 = vmul.f32 1.442695, %v1078_v59  ;;  %v1630_v59 = vld [vmem:[#allocation8 + $0x18] sm:$0xff] }
 0x352   : > { %v922_v61 = vpop.permute.xlu1 %921  ;;  %v1242_v62 = vpop.xlane.xlu0 %1241 }
 0x353   : > { %2294 = vpow2.f32 %v1079_v60  ;;  %v1243_v63 = vsub.f32 %v1237_v46, %v1242_v62  ;;  %2088 = vmatpush3.msra.mxu1 %v922_v61 }
 0x354   : > { %2097 = vmatprep.subr.mxu1 %v2499_v1 }
 0x355   : > { %v1244_v2 = vmul.f32 1.442695, %v1243_v63 }
 0x356   : > { %v1407_v3 = vpop.xlane.xlu0 %1406 }
 0x357   : > { %2296 = vpow2.f32 %v1244_v2  ;;  %v1408_v4 = vsub.f32 %v1402_v50, %v1407_v3 }
 0x359   : > { %v1409_v5 = vmul.f32 1.442695, %v1408_v4 }
 0x35b   : > { %2298 = vpow2.f32 %v1409_v5 }
 0x35d   : > { %v2295_v6 = vpop.eup %2294 }
 0x35e   : > { %v1081_v7 = vsel %vm833_vm3, %v2295_v6, 0.0 }
 0x35f   : > { %1082 = vadd.xlane.f32.xlu0 %v1081_v7 }
 0x361   : > { %v2297_v8 = vpop.eup %2296 }
 0x362   : > { %v1246_v9 = vsel %vm833_vm3, %v2297_v8, 0.0 }
 0x363   : > { %1247 = vadd.xlane.f32.xlu1 %v1246_v9 }
 0x365   : > { %v2299_v10 = vpop.eup %2298 }
 0x366   : > { %v1411_v11 = vsel %vm833_vm3, %v2299_v10, 0.0 }
 0x367   : > { %1412 = vadd.xlane.f32.xlu0 %v1411_v11 }
 0x374   : > { %1251 = vrot.lane.b32.xlu1 %v2850_v23, %s2504_s20  ;;  %s3106_s20 = sld [smem:[#allocation24_spill]] }
 0x378   : > { %1416 = vrot.lane.b32.xlu1 %v2850_v23, %s2505_s19  ;;  %s3104_s19 = sld [smem:[#allocation27_spill]] }
 0x37d   : > { %1086 = vrot.lane.b32.xlu0 %v2850_v23, %s2506_s1  ;;  %s3111_s1 = sld [smem:[#allocation30_spill]] }
 0x37e   : > { %v1713_v61 = vld [vmem:[%s3104_s19 + $0x8] sm:$0xff]  ;;  %v1714_v62 = vld [vmem:[%s3104_s19 + $0x10] sm:$0xff]  ;;  %v1715_v2 = vld [vmem:[%s3104_s19 + $0x18] sm:$0xff] }
 0x37f   : > { %v2191_v3 = vpack.c.bf16 %v1715_v2, %v1714_v62  ;;  %v1716_v4 = vld [vmem:[%s3104_s19 + $0x20] sm:$0xff]  ;;  %v1717_v5 = vld [vmem:[%s3104_s19 + $0x28] sm:$0xff] }
 0x383   : > { %v918_v12 = vpop.xlane.xlu1 %917 }
 0x384   : > { %2300 = vrcp.f32 %v918_v12 }
 0x38e   : > { %v2301_v13 = vpop.eup %2300 }
 0x38f   : > { %v920_v14 = vmul.f32 %v2301_v13, %v2293_v56  ;;  %v1627_v56 = vld [vmem:[#allocation8] sm:$0xff] }
 0x390   : > { %v2182_v58 = vpack.c.bf16 %v1628_v57, %v1627_v56 }
 0x391   : > { %2090 = vmatmul.mubr.msk.f32.vlgmr.msra.gmra.mrb[4].mxu1 %vm833_vm3, %v920_v14 }
 0x392   : > { %2099 = vmatprep.mubr.msk.f32.mxu1 %vm2498_vm0, %v2499_v1 }
 0x3ec   : > { %v1083_v16 = vpop.xlane.xlu0 %1082 }
 0x3ed   : > { %2302 = vrcp.f32 %v1083_v16 }
 0x3f0   : > { %v1248_v17 = vpop.xlane.xlu1 %1247 }
 0x3f1   : > { %2304 = vrcp.f32 %v1248_v17 }
 0x3f4   : > { %v1413_v18 = vpop.xlane.xlu0 %1412  ;;  %v1252_v21 = vpop.permute.xlu1 %1251 }
 0x3f5   : > { %2306 = vrcp.f32 %v1413_v18  ;;  %v2003_v18 = vld [vmem:[%s3105_s12] ss:$0 sm:$0xff] }
 0x3f7   : > { %v2303_v19 = vpop.eup %2302 }
 0x3f8   : > { %v1085_v20 = vmul.f32 %v2303_v19, %v2295_v6  ;;  %v1087_v22 = vpop.permute.xlu0 %1086  ;;  %v1417_v25 = vpop.permute.xlu1 %1416  ;;  %v2194_v6 = vpack.c.bf16 %v1717_v5, %v1716_v4 }
 0x3f9   : > { %2098 = vmatpush3.msra.mxu1 %v1087_v22  ;;  %v1718_v22 = vld [vmem:[%s3104_s19 + $0x30] sm:$0xff] }
 0x3fa   : > { %2100 = vmatmul.mubr.msk.f32.vlgmr.msra.gmra.mrb[6].mxu1 %vm833_vm3, %v1085_v20  ;;  %2107 = vmatprep.subr.mxu1 %v2499_v1 }
 0x3fb   : > { %v2305_v23 = vpop.eup %2304  ;;  %2108 = vmatpush3.msra.mxu1 %v1252_v21  ;;  %2109 = vmatprep.mubr.msk.f32.mxu1 %vm2498_vm0, %v2499_v1 }
 0x3fc   : > { %v1250_v24 = vmul.f32 %v2305_v23, %v2297_v8  ;;  %2117 = vmatprep.subr.mxu1 %v2499_v1  ;;  %v1719_v23 = vld [vmem:[%s3104_s19 + $0x38] sm:$0xff] }
 0x3fe   : > { %2110 = vmatmul.mubr.msk.f32.vlgmr.msra.gmra.mrb[8].mxu1 %vm833_vm3, %v1250_v24  ;;  %v2197_v24 = vpack.c.bf16 %v1719_v23, %v1718_v22 }
 0x3ff   : > { %v2307_v26 = vpop.eup %2306  ;;  %2118 = vmatpush3.msra.mxu1 %v1417_v25  ;;  %2119 = vmatprep.mubr.msk.f32.mxu1 %vm2498_vm0, %v2499_v1  ;;  %v2005_v25 = vld [vmem:[%s3107_s10] ss:$0 sm:$0xff]  ;;  %s3112_s10 = sld [smem:[#allocation31_spill]] }
 0x400   : > { %v1415_v27 = vmul.f32 %v2307_v26, %v2299_v10  ;;  %2181 = vmatprep.subr.bf16.mxu1 %v2497_v0 }
 0x402   : > { %2120 = vmatmul.mubr.msk.f32.vlgmr.msra.gmra.mrb[10].mxu1 %vm833_vm3, %v1415_v27 }
 0x403   : > { %2141 = vmatprep.mubr.msk.f32.mxu1 %vm2498_vm0, %v2499_v1  ;;  %2183 = vmatpush3.bf16.msra.mxu1 %v2182_v58 }
 0x404   : > { %2184 = vmatprep.subr.bf16.mxu1 %v2497_v0 }
 0x405   : > { %s2988_s0 = scalar_lea.hbm %s3112_s10, %s2012_s30 }
 0x464   : > { %v993_v28 = vpop.f32.mrb[4].mxu1 }
 0x465   : > { %v2091_v29 = vpop.f32.mrb[5].mxu1 }
 0x4cd   : > { %v1158_v36 = vpop.f32.mrb[6].mxu1 }
 0x4ce   : > { %1493 = vrot.lane.b32.xlu0 %v1158_v36, %s2507_s15  ;;  %v2101_v37 = vpop.f32.mrb[7].mxu1  ;;  %s3108_s15 = sld [smem:[#allocation28_spill]] }
 0x4d1   : > { %v1323_v38 = vpop.f32.mrb[8].mxu1 }
 0x4d2   : > { %1497 = vrot.lane.b32.xlu1 %v1323_v38, %s2508_s14  ;;  %v2111_v39 = vpop.f32.mrb[9].mxu1  ;;  %s3109_s14 = sld [smem:[#allocation19_spill]] }
 0x4d4   : > { %v2007_v30 = vld [vmem:[%s3108_s15] ss:$0 sm:$0xff]  ;;  %s2400_s15 = scalar_lea.vmem %s2990_s17, 128 }
 0x4d5   : > { %v1488_v40 = vpop.f32.mrb[10].mxu1  ;;  %p2401_p0 = scmp.ne.s32.totalorder %s2990_s17, %s2400_s15 }
 0x4d6   : > { %1501 = vrot.lane.b32.xlu0 %v1488_v40, %s2509_s13  ;;  %v2121_v41 = vpop.f32.mrb[11].mxu1  ;;  %s2406_s13 = scalar_lea.vmem %s2405_s9, 256 }
 0x4d7   : > { %p2408_p7 = scmp.lt.s32.totalorder %s2406_s13, %s2400_s15 }
 0x4d8   : > { %p3113_p5 = scmp.ne.s32.totalorder %s3109_s14, 0 }
 0x4d9   : > { %p2409_p4 = por %p2408_p7, %p2407_p2 }
 0x4da   : > { %p2402_p9 = pnand %p2401_p0, %p3113_p5 }
 0x4dc   : > { %p2403_p1 = pneg %p2402_p9 }
 0x4de   : > { %p2410_p8 = pnand %p2409_p4, %p2403_p1 }
 0x540   : > { %v1494_v42 = vpop.permute.xlu0 %1493 }
 0x541   : > { %v1504_v44 = vsel %vm833_vm3, %v993_v28, %v1494_v42 }
 0x544   : > { %v1498_v43 = vpop.permute.xlu1 %1497 }
 0x545   : > { %v1506_v45 = vsel %vm1505_vm4, %v1504_v44, %v1498_v43 }
 0x548   : > { %v1502_v46 = vpop.permute.xlu0 %1501 }
 0x549   : > { %v1508_v47 = vsel %vm1507_vm5, %v1506_v45, %v1502_v46 }
 0x54a   : > { %2131 = vmatmul.mubr.msk.f32.vlgmr.msra.gmra.mrb[8].mxu0 %vm663_vm1, %v1508_v47 }
 0x54b   : > { %2160 = vmatprep.mubr.msk.f32.mxu0 %vm2498_vm0, %v2499_v1  ;;  %v1629_v1 = vld [vmem:[#allocation8 + $0x10] sm:$0xff] }
 0x54c   : > { %v2185_v60 = vpack.c.bf16 %v1630_v59, %v1629_v1 }
 0x54e   : > { %2186 = vmatpush3.bf16.msra.mxu1 %v2185_v60 }
 0x61d   : > { %v1589_v49 = vpop.f32.mrb[8].mxu0 }
 0x61e   : > { %v1590_v50 = vadd.f32 %v2001_v48, %v1589_v49  ;;  %v2132_v51 = vpop.f32.mrb[9].mxu0  ;;  %v2009_v48 = vld [vmem:[%s3110_s26] ss:$0 sm:$0xff] }
 0x620   : > { %v1593_v52 = vadd.f32 %v1590_v50, %v2836_v15  ;;  %v1712_v15 = vld [vmem:[%s3104_s19] sm:$0xff] }
 0x621   : > { %v2188_v63 = vpack.c.bf16 %v1713_v61, %v1712_v15  ;;  %v2010_v50 = vld [vmem:[%s3111_s1] ss:$0 sm:$0xff] }
 0x622   : > { %v1596_v53 = vsel %vm663_vm1, %v1593_v52, 0.0  ;;  %v1601_v54 = vmul.f32 %v1593_v52, %v1593_v52 }
 0x623   : > { %1597 = vadd.xlane.f32.xlu1 %v1596_v53  ;;  %2189 = vmatpush3.bf16.msra.mxu0 %v2188_v63 }
 0x624   : > { %v1602_v55 = vsel %vm663_vm1, %v1601_v54, 0.0  ;;  %2190 = vmatprep.subr.bf16.mxu0 %v2497_v0 }
 0x625   : > { %1603 = vadd.xlane.f32.xlu0 %v1602_v55 }
 0x627   : > { %2192 = vmatpush3.bf16.msra.mxu0 %v2191_v3 }
 0x628   : > { %2193 = vmatprep.subr.bf16.mxu0 %v2497_v0 }
 0x62b   : > { %2195 = vmatpush3.bf16.msra.mxu0 %v2194_v6 }
 0x62c   : > { %2196 = vmatprep.subr.bf16.mxu0 %v2497_v0  ;;  %v2004_v0 = vld [vmem:[%s3106_s20] ss:$0 sm:$0xff] }
 0x62f   : > { %2198 = vmatpush3.bf16.msra.mxu0 %v2197_v24 }
 0x6b0   : > { %v1598_v7 = vpop.xlane.xlu1 %1597 }
 0x6b1   : > { %v1600_v8 = vmul.f32 0.03125, %v1598_v7 }
 0x6b2   : > { %v1604_v9 = vpop.xlane.xlu0 %1603 }
 0x6b3   : > { %v1606_v10 = vmul.f32 %v1600_v8, %v1600_v8  ;;  %v1605_v11 = vmul.f32 0.03125, %v1604_v9  ;;  %v1609_v16 = vsub.f32 %v1593_v52, %v1600_v8 }
 0x6b5   : > { %v1607_v12 = vsub.f32 %v1605_v11, %v1606_v10 }
 0x6b7   : > { %v1608_v13 = vmax.f32 %v1607_v12, 0.0 }
 0x6b9   : > { %v1610_v14 = vadd.f32 1e-06, %v1608_v13 }
 0x6bb   : > { %2308 = vrsqrt.f32 %v1610_v14 }
 0x6c5   : > { %v2309_v17 = vpop.eup %2308 }
 0x6c6   : > { %v1612_v19 = vmul.f32 %v2309_v17, %v1609_v16 }
 0x6c8   : > { %v1619_v20 = vmul.f32 %v2003_v18, %v1612_v19 }
 0x6ca   : > { %v1626_v21 = vadd.f32 %v2004_v0, %v1619_v20 }
 0x6cc   : > { %2142 = vmatmul.mubr.msk.f32.vlgmr.msra.gmra.mrb[12].mxu1 %vm663_vm1, %v1626_v21 }
 0x79f   : > { %v1707_v26 = vpop.f32.mrb[12].mxu1 }
 0x7a0   : > { %v1708_v27 = vadd.f32 %v2005_v25, %v1707_v26  ;;  %v2143_v28 = vpop.f32.mrb[13].mxu1 }
 0x7a2   : > { %v1711_v29 = vmax.f32 %v1708_v27, 0.0 }
 0x7a4   : > { %2161 = vmatmul.mubr.msk.f32.vlgmr.msra.gmra.mrb[10].mxu0 %vm737_vm2, %v1711_v29 }
 0x877   : > { %v1797_v31 = vpop.f32.mrb[10].mxu0 }
 0x878   : > { %v1798_v32 = vadd.f32 %v2007_v30, %v1797_v31  ;;  %v2162_v33 = vpop.f32.mrb[11].mxu0 }
 0x87a   : > { %v1801_v34 = vadd.f32 %v1798_v32, %v1626_v21 }
 0x87c   : > { %v1804_v35 = vsel %vm663_vm1, %v1801_v34, 0.0  ;;  %v1808_v36 = vmul.f32 %v1801_v34, %v1801_v34 }
 0x87d   : > { %1805 = vadd.xlane.f32.xlu0 %v1804_v35 }
 0x87e   : > { %v1809_v37 = vsel %vm663_vm1, %v1808_v36, 0.0 }
 0x87f   : > { %1810 = vadd.xlane.f32.xlu1 %v1809_v37 }
 0x90a   : > { %v1806_v38 = vpop.xlane.xlu0 %1805 }
 0x90b   : > { %v1807_v39 = vmul.f32 0.03125, %v1806_v38 }
 0x90c   : > { %v1811_v40 = vpop.xlane.xlu1 %1810 }
 0x90d   : > { %v1813_v41 = vmul.f32 %v1807_v39, %v1807_v39  ;;  %v1812_v42 = vmul.f32 0.03125, %v1811_v40  ;;  %v1816_v46 = vsub.f32 %v1801_v34, %v1807_v39 }
 0x90f   : > { %v1814_v43 = vsub.f32 %v1812_v42, %v1813_v41 }
 0x911   : > { %v1815_v44 = vmax.f32 %v1814_v43, 0.0 }
 0x913   : > { %v1817_v45 = vadd.f32 1e-06, %v1815_v44 }
 0x915   : > { %2310 = vrsqrt.f32 %v1817_v45 }
 0x91f   : > { %v2311_v47 = vpop.eup %2310 }
 0x920   : > { %v1819_v49 = vmul.f32 %v2311_v47, %v1816_v46 }
 0x922   : > { %v1826_v51 = vmul.f32 %v2009_v48, %v1819_v49 }
 0x924   : > { %v1833_v52 = vadd.f32 %v2010_v50, %v1826_v51 }
 0x926   : > { %1834 = vst.msk [vmem:[%s642_s18] sm:$0xff] %vm663_vm1, %v1833_v52 }
 0x927   : > { %2413 = shalt.err (!%p2410_p8)
}
 0x928   : > { %s2414_s24 = scalar_lea.hbm %s2988_s0, 128  ;;  %s2418_s23 = scalar_lea.hbm %s3112_s10, 256 }
 0x929   : > { %p2415_p11 = scmp.ne.s32.totalorder %s2988_s0, %s2414_s24  ;;  %p2419_p13 = scmp.lt.u32.totalorder %s2988_s0, %s3112_s10 }
 0x92a   : > { %p2420_p3 = scmp.lt.u32.totalorder %s2418_s23, %s2414_s24  ;;  %p2422_p0 = scmp.lt.u32.totalorder %s2414_s24, %s2988_s0 }
 0x92b   : > { %p2416_p6 = pnand %p2415_p11, %p3113_p5 }
 0x92c   : > { %p2421_p12 = por %p2420_p3, %p2419_p13 }
 0x92d   : > { %p2417_p10 = pneg %p2416_p6 }
 0x92e   : > { %p2423_p9 = por %p2422_p0, %p2421_p12 }
 0x930   : > { %p2424_p1 = pnand %p2423_p9, %p2417_p10 }
 0x932   : > { %2427 = shalt.err (!%p2424_p1)
}
 0x933   : > { %2207 = dma.vmem_to_hbm [thread:$0]  (%p3113_p5), %s2990_s17, 128, %s2988_s0, %s1836_s21  }
 0x934 PF: > { %s3114_s30 = sld [smem:[#allocation14_spill]]  ;;  %s3115_s18 = sld [smem:[#allocation17_spill]] }
 0x935   : > { %p3117_p7 = scmp.ge.s32.totalorder %s2490_s29, 2 }
 0x93a   : > { %s1862_s22 = sand.u32 1, %s3114_s30   ;;  %p3116_p2 = scmp.ne.s32.totalorder %s3115_s18, 0 }
 0x93b   : > { %s1863_s28 = scalar_lea.sflag [#allocation5], %s1862_s22 }
 0x93c   : > { %p2221_p4 = pnand %p3117_p7, %p3116_p2 }
 0x93e   : > { %2465 = dma.done.wait (!%p2221_p4), %s1863_s28, 128  }
 0x93f   : > { %2467 = vsyncadd (!%p2221_p4), %s1863_s28, 4294967168  ;;  %s36_s29 = sadd.s32 1, %s2490_s29   ;;  %s3118_s15 = sld [smem:[#allocation15_spill]] }
 0x940   : > { %p33_p8 = scmp.ge.s32.totalorder %s36_s29, 4   ;;  %s3119_s26 = sld [smem:[#allocation20_spill]] }
 0x941   : > { %s3120_s27 = sld [smem:[#allocation16_spill]]  ;;  %s3121_s28 = sld [smem:[#allocation18_spill]] }
 0x942   : > { %s3122_s24 = smov %s2474_s25  ;;  %35 = sbr.rel (!%p33_p8) target bundleno = 20 (0x14), region = 157 }
 0x945   : > { %s3123_s25 = smov %s3118_s15 }
 0x949   :  { %1868 = vsyncpa [#allocation4], 1 }
 0x94a   :  { %1870 = vsyncpa [#allocation4 + $0x1], 1 }
 0x94b   :  { %1871 = vsyncpa [#allocation7], 1 }
 0x94c   :  { %1873 = vsyncpa [#allocation7 + $0x1], 1 }
 0x94d   :  { %1874 = vsyncpa [#allocation5], 1 }
 0x94e   :  { %1876 = vsyncpa [#allocation5 + $0x1], 1 }

// kernel: tpu_custom_call.1
= control target key start
LH: loop header
LB: loop body
LE: loop exit
PB: predicated region body
PF: predicated region fallthrough
CT: control target
= control target key end

     0   :  { %s3038_s0 = inlined_call_operand.hbm [shape: f32[2,8,32], index: 0, kind: input, shape index: {}]   ;;  %s3039_s1 = inlined_call_operand.hbm [shape: f32[2,8,32], index: 1, kind: input, shape index: {}]   ;;  %s3040_s2 = inlined_call_operand.vmem [shape: f32[2,1,8], index: 2, kind: input, shape index: {}]   ;;  %s3041_s3 = inlined_call_operand.vmem [shape: f32[32,32], index: 3, kind: input, shape index: {}]   ;;  %s3042_s4 = inlined_call_operand.vmem [shape: f32[1,32], index: 4, kind: input, shape index: {}]   ;;  %s3043_s5 = inlined_call_operand.vmem [shape: f32[32,64], index: 5, kind: input, shape index: {}]   ;;  %s3044_s6 = inlined_call_operand.vmem [shape: f32[1,64], index: 6, kind: input, shape index: {}]   ;;  %s3045_s7 = inlined_call_operand.vmem [shape: f32[32,32], index: 7, kind: input, shape index: {}]   ;;  %s3046_s8 = inlined_call_operand.vmem [shape: f32[1,32], index: 8, kind: input, shape index: {}]   ;;  %s3047_s9 = inlined_call_operand.vmem [shape: f32[1,32], index: 9, kind: input, shape index: {}]   ;;  %s3048_s10 = inlined_call_operand.vmem [shape: f32[1,32], index: 10, kind: input, shape index: {}]   ;;  %s3049_s11 = inlined_call_operand.hbm [shape: f32[32,64], index: 11, kind: input, shape index: {}]   ;;  %s3050_s12 = inlined_call_operand.vmem [shape: f32[1,64], index: 12, kind: input, shape index: {}]   ;;  %s3051_s13 = inlined_call_operand.vmem [shape: f32[64,32], index: 13, kind: input, shape index: {}]   ;;  %s3052_s14 = inlined_call_operand.vmem [shape: f32[1,32], index: 14, kind: input, shape index: {}]   ;;  %s3053_s15 = inlined_call_operand.vmem [shape: f32[1,32], index: 15, kind: input, shape index: {}]   ;;  %s3054_s16 = inlined_call_operand.vmem [shape: f32[1,32], index: 16, kind: input, shape index: {}]   ;;  %s3055_s17 = inlined_call_operand.hbm [shape: f32[2,8,32], index: 17, kind: output, shape index: {}]  }
   0x1   :  { %3071 = sst [smem:[#allocation21_spill]] %s3038_s0 }
   0x2   :  { %3072 = sst [smem:[#allocation22_spill]] %s3039_s1 }
   0x3   :  { %3073 = sst [smem:[#allocation23_spill]] %s3047_s9 }
   0x4   :  { %3074 = sst [smem:[#allocation24_spill]] %s3048_s10 }
   0x5   :  { %3075 = sst [smem:[#allocation25_spill]] %s3049_s11 }
   0x6   :  { %3076 = sst [smem:[#allocation26_spill]] %s3050_s12 }
   0x7   :  { %3077 = sst [smem:[#allocation27_spill]] %s3051_s13 }
   0x8   :  { %3078 = sst [smem:[#allocation28_spill]] %s3052_s14 }
   0x9   :  { %3079 = sst [smem:[#allocation29_spill]] %s3053_s15 }
   0xa   :  { %3080 = sst [smem:[#allocation30_spill]] %s3054_s16 }
   0xb   :  { %3081 = sst [smem:[#allocation31_spill]] %s3055_s17 }
   0xc   :  { %22 = vsyncpa [#allocation4], 0 }
   0xd   :  { %24 = vsyncpa [#allocation4 + $0x1], 0 }
   0xe   :  { %25 = vsyncpa [#allocation7], 0 }
   0xf   :  { %27 = vsyncpa [#allocation7 + $0x1], 0 }
  0x10   :  { %28 = vsyncpa [#allocation5], 0 }
  0x11   :  { %30 = vsyncpa [#allocation5 + $0x1], 0  ;;  %s2601_s24 = smov 0   ;;  %s2603_s25 = smov 0  }
  0x12   :  { %s2605_s26 = smov 0   ;;  %s2607_s27 = smov 0  }
  0x13   :  { %s2609_s28 = smov 0   ;;  %s2611_s29 = smov 0  }
  0x14 LB: > { %3082 = sst [smem:[#allocation14_spill]] %s2470_s24  ;;  %s2632_s0 = sadd.s32 4294967295, %s2490_s29   ;;  %s2490_s29 = sphi %s2611_s29, %s36_s29   ;;  %s2486_s28 = sphi %s2609_s28, %s3121_s28   ;;  %s2482_s27 = sphi %s2607_s27, %s3120_s27   ;;  %s2478_s26 = sphi %s2605_s26, %s3119_s26   ;;  %s2474_s25 = sphi %s2603_s25, %s3123_s25   ;;  %s2470_s24 = sphi %s2601_s24, %s3122_s24  }
  0x15   : > { %3083 = sst [smem:[#allocation15_spill]] %s2478_s26  ;;  %s1972_s30 = sadd.s32 4294967294, %s2490_s29  }
  0x16   : > { %3084 = sst [smem:[#allocation16_spill]] %s2486_s28  ;;  %p70_p0 = scmp.ne.s32.totalorder %s2474_s25, %s2470_s24 }
  0x17   : > { %p3061_p1 = scmp.eq.s32.totalorder %s2632_s0, 0  ;;  %p448_p3 = scmp.eq.s32.totalorder %s1972_s30, 1 }
  0x18   : > { %p1973_p5 = scmp.ge.s32.totalorder %s2490_s29, 1  ;;  %p455_p7 = scmp.lt.s32.totalorder %s2490_s29, 3 }
  0x19   : > { %p2641_p4 = por %p3061_p1, %p70_p0  ;;  %p2646_p6 = por %p448_p3, %p70_p0 }
  0x1a   : > { %p2651_p8 = pnand %p1973_p5, %p455_p7  ;;  %s2492_s20 = smov [#allocation8]  }
  0x1b   : > { %s3085_s18 = scalar_select %p2641_p4, 1, 0 }
  0x1c   : > { %s3086_s19 = scalar_select %p2646_p6, 1, 0 }
  0x1d   : > { %s3088_s1 = scalar_select %p2651_p8, 1, 0 }
  0x1e   : > { %3087 = sst [smem:[#allocation17_spill]] %s3086_s19  ;;  %s491_s21 = sshll.u32 %s2492_s20, 4  ;;  %s492_s21 = int_to_ptr.vmem [resolvable:$true] %s491_s21 }
  0x1f   : > { %p2209_p9 = pneg %p2651_p8  ;;  %s48_s23 = sadd.s32 1, %s2486_s28 }
  0x20   : > { %s3090_s11 = sld [smem:[#allocation25_spill]] }
  0x21   : > { %p2660_p11 = pnand %p2209_p9, %p3061_p1 }
  0x23   : > { %p2314_p13 = pneg %p2660_p11 }
  0x26   : > { %s2312_s24 = scalar_lea.hbm %s3090_s11, 512 }
  0x27   : > { %p2313_p12 = scmp.ne.s32.totalorder %s3090_s11, %s2312_s24  ;;  %p2319_p5 = scmp.lt.u32.totalorder %s2312_s24, %s3090_s11 }
  0x29   : > { %p2315_p0 = pnand %p2314_p13, %p2313_p12 }
  0x2b   : > { %p2316_p3 = pneg %p2315_p0 }
  0x2d   : > { %p2321_p7 = pnand %p2319_p5, %p2316_p3 }
  0x2f   : > { %2324 = shalt.err (!%p2321_p7)
}
  0x30   : > { %s2325_s14 = scalar_lea.vmem %s492_s21, 512  ;;  %p2333_p2 = scmp.lt.s32.totalorder %s492_s21, %s492_s21 }
  0x31   : > { %p2326_p9 = scmp.ne.s32.totalorder %s492_s21, %s2325_s14  ;;  %p2334_p6 = scmp.lt.s32.totalorder %s2325_s14, %s2325_s14 }
  0x33   : > { %p2328_p10 = pnand %p2326_p9, %p2314_p13  ;;  %p2335_p4 = por %p2334_p6, %p2333_p2 }
  0x35   : > { %p2329_p1 = pneg %p2328_p10 }
  0x37   : > { %p2336_p8 = pnand %p2335_p4, %p2329_p1 }
  0x39   : > { %2339 = shalt.err (!%p2336_p8)
}
  0x3a   : > { %s2493_s16 = smov 128   ;;  %s2494_s15 = smov 8  }
  0x3b   : > { %2212 = dma.hbm_to_vmem [thread:$0]  (!%p2660_p11), %s3090_s11, 512, %s492_s21, [#allocation7], %s2493_s16, %s2493_s16, %s2494_s15  }
  0x3c   : > { %p50_p1 = scmp.ge.s32.totalorder %s48_s23, 2  ;;  %s57_s14 = sadd.s32 1, %s2478_s26 }
  0x3d   : > { %p64_p2 = scmp.ne.s32.totalorder %s2478_s26, %s2474_s25  ;;  %p65_p4 = scmp.eq.s32.totalorder %s2490_s29, 0 }
  0x3e   : > { %s3125_s23 = smov (%p50_p1, %s48_s23), 0  ;;  %p3093_p8 = scmp.eq.s32.totalorder %s2632_s0, 1 }
  0x3f   : > { %3091 = sst [smem:[#allocation18_spill]] %s3125_s23  ;;  %p2687_p6 = por %p65_p4, %p64_p2 }
  0x40   : > { %p2693_p10 = por %p3093_p8, %p64_p2  ;;  %s52_s30 = ssub.s32 %s2486_s28, %s3125_s23 }
  0x41   : > { %p2225_p11 = scmp.lt.s32.totalorder %s2490_s29, 2  ;;  %p55_p12 = scmp.eq.s32.totalorder %s52_s30, 0 }
  0x42   : > { %s3094_s22 = scalar_select %p2693_p10, 1, 0 }
  0x43   : > { %s520_s21 = sand.u32 1, %s2478_s26   ;;  %s1977_s15 = sshll.u32 %s2486_s28, 7 }
  0x44   : > { %3095 = sst [smem:[#allocation19_spill]] %s3094_s22  ;;  %s2701_s20 = sshll.u32 %s520_s21, 3 }
  0x45   : > { %s2704_s16 = scalar_select %p55_p12, %s2478_s26, %s57_s14  }
  0x46   : > { %s3097_s11 = sld [smem:[#allocation21_spill]]  ;;  %s524_s10 = scalar_lea.vmem [#allocation3], %s2701_s20 }
  0x47   : > { %3096 = sst [smem:[#allocation20_spill]] %s2704_s16  ;;  %s532_s23 = sshll.u32 %s524_s10, 4  ;;  %s2713_s23 = int_to_ptr.vmem [resolvable:$true] %s532_s23 }
  0x48   : > { %p2717_p13 = pnand %p2225_p11, %p2687_p6  ;;  %s3099_s16 = sld [smem:[#allocation22_spill]] }
  0x49   : > { %s539_s24 = sand.u32 1, %s2490_s29   ;;  %s521_s26 = scalar_lea.sflag [#allocation4], %s520_s21 }
  0x4a   : > { %p2342_p3 = pneg %p2717_p13 }
  0x4c   : > { %s2710_s12 = scalar_lea.hbm %s3097_s11, %s1977_s15  ;;  %s2345_s9 = scalar_lea.hbm %s3097_s11, 256 }
  0x4d   : > { %s2340_s22 = scalar_lea.hbm %s2710_s12, 128  ;;  %p2346_p9 = scmp.lt.u32.totalorder %s2710_s12, %s3097_s11 }
  0x4e   : > { %s2724_s17 = scalar_lea.hbm %s3099_s16, %s1977_s15  ;;  %p2341_p0 = scmp.ne.s32.totalorder %s2710_s12, %s2340_s22 }
  0x4f   : > { %p2347_p1 = scmp.lt.u32.totalorder %s2345_s9, %s2340_s22  ;;  %p2349_p4 = scmp.lt.u32.totalorder %s2340_s22, %s2710_s12 }
  0x50   : > { %p2343_p5 = pnand %p2342_p3, %p2341_p0 }
  0x51   : > { %p2348_p2 = por %p2347_p1, %p2346_p9 }
  0x52   : > { %p2344_p7 = pneg %p2343_p5 }
  0x53   : > { %p2350_p6 = por %p2349_p4, %p2348_p2 }
  0x55   : > { %p2351_p8 = pnand %p2350_p6, %p2344_p7 }
  0x57   : > { %2354 = shalt.err (!%p2351_p8)
}
  0x58   : > { %s2355_s21 = scalar_lea.vmem %s2713_s23, 128  ;;  %s2495_s15 = smov [#allocation3]  }
  0x59   : > { %p2356_p11 = scmp.ne.s32.totalorder %s2713_s23, %s2355_s21  ;;  %s2360_s14 = sshll.u32 %s2495_s15, 4  ;;  %s2361_s14 = int_to_ptr.vmem [resolvable:$false] %s2360_s14 }
  0x5a   : > { %s2362_s13 = scalar_lea.vmem %s2361_s14, 256  ;;  %p2363_p5 = scmp.lt.s32.totalorder %s2713_s23, %s2361_s14 }
  0x5b   : > { %p2358_p12 = pnand %p2356_p11, %p2342_p3  ;;  %p2364_p9 = scmp.lt.s32.totalorder %s2362_s13, %s2355_s21 }
  0x5d   : > { %p2359_p0 = pneg %p2358_p12  ;;  %p2365_p1 = por %p2364_p9, %p2363_p5 }
  0x5f   : > { %p2366_p2 = pnand %p2365_p1, %p2359_p0 }
  0x61   : > { %2369 = shalt.err (!%p2366_p2)
}
  0x62   : > { %2216 = dma.hbm_to_vmem [thread:$0]  (!%p2717_p13), %s2710_s12, 128, %s2713_s23, %s521_s26  }
  0x63   : > { %s543_s9 = scalar_lea.vmem [#allocation6], %s2701_s20  ;;  %s540_s10 = scalar_lea.sflag [#allocation7], %s539_s24 }
  0x64   : > { %s550_s22 = sshll.u32 %s543_s9, 4  ;;  %s2370_s19 = scalar_lea.hbm %s2724_s17, 128  ;;  %s551_s22 = int_to_ptr.vmem [resolvable:$true] %s550_s22 }
  0x65   : > { %p2371_p7 = scmp.ne.s32.totalorder %s2724_s17, %s2370_s19  ;;  %s2375_s15 = scalar_lea.hbm %s3099_s16, 256 }
  0x66   : > { %p2376_p8 = scmp.lt.u32.totalorder %s2724_s17, %s3099_s16  ;;  %p2377_p11 = scmp.lt.u32.totalorder %s2375_s15, %s2370_s19 }
  0x67   : > { %p2373_p4 = pnand %p2371_p7, %p2342_p3  ;;  %p2379_p0 = scmp.lt.u32.totalorder %s2370_s19, %s2724_s17 }
  0x68   : > { %p2378_p12 = por %p2377_p11, %p2376_p8 }
  0x69   : > { %p2374_p6 = pneg %p2373_p4 }
  0x6a   : > { %p2380_p5 = por %p2379_p0, %p2378_p12 }
  0x6c   : > { %p2381_p9 = pnand %p2380_p5, %p2374_p6 }
  0x6e   : > { %2384 = shalt.err (!%p2381_p9)
}
  0x6f   : > { %s2385_s12 = scalar_lea.vmem %s551_s22, 128  ;;  %s2496_s26 = smov [#allocation6]  }
  0x70   : > { %p2386_p1 = scmp.ne.s32.totalorder %s551_s22, %s2385_s12  ;;  %s2390_s23 = sshll.u32 %s2496_s26, 4  ;;  %s2391_s23 = int_to_ptr.vmem [resolvable:$false] %s2390_s23 }
  0x71   : > { %s2392_s20 = scalar_lea.vmem %s2391_s23, 256  ;;  %p2393_p4 = scmp.lt.s32.totalorder %s551_s22, %s2391_s23 }
  0x72   : > { %p2388_p2 = pnand %p2386_p1, %p2342_p3  ;;  %p2394_p10 = scmp.lt.s32.totalorder %s2392_s20, %s2385_s12 }
  0x74   : > { %p2389_p7 = pneg %p2388_p2  ;;  %p2395_p8 = por %p2394_p10, %p2393_p4 }
  0x76   : > { %p2396_p11 = pnand %p2395_p8, %p2389_p7 }
  0x78   : > { %2399 = shalt.err (!%p2396_p11)
}
  0x79   : > { %2219 = dma.hbm_to_vmem [thread:$0]  (!%p2717_p13), %s2724_s17, 128, %s551_s22, %s540_s10  }
  0x7a   : > { %p3100_p6 = scmp.ne.s32.totalorder %s3088_s1, 0 }
  0x7b   : > { %s2777_s24 = sand.u32 (!%p3100_p6), 1, %s2474_s25   ;;  %p3101_p10 = scmp.ne.s32.totalorder (!%p3100_p6), %s3085_s18, 0 }
  0x7c   : > { %565 = sbr.rel (%p3100_p6) target bundleno = 2356 (0x934), region = 88  ;;  %s2780_s9 = sshll.u32 (!%p3100_p6), %s2777_s24, 3 }
  0x7d   : > { %s568_s19 = scalar_lea.sflag (!%p3100_p6), [#allocation4], %s2777_s24  ;;  %s571_s28 = scalar_lea.vmem (!%p3100_p6), [#allocation3], %s2780_s9 }
  0x83   : > { %2453 = dma.done.wait (%p3101_p10), %s568_s19, 128  }
  0x84   : > { %2455 = vsyncadd (%p3101_p10), %s568_s19, 4294967168  ;;  %s576_s1 = sand.u32 1, %s2632_s0   ;;  %s580_s17 = scalar_lea.vmem [#allocation6], %s2780_s9 }
  0x85   : > { %s577_s30 = scalar_lea.sflag [#allocation7], %s576_s1 }
  0x86   : > { %2457 = dma.done.wait (%p3101_p10), %s577_s30, 128  }
  0x87   : > { %2459 = vsyncadd (%p3101_p10), %s577_s30, 4294967168  ;;  %p3102_p13 = scmp.eq.s32.totalorder %s2632_s0, 0 }
  0x89   : > { %2461 = dma.done.wait (%p3102_p13), [#allocation7], 512   ;;  %p3103_p3 = pmov %p3102_p13 }
  0x8a   : > { %v2497_v0 = vmov 0.0|0.0   ;;  %vm2498_vm0 = vmmov 0   ;;  %v2499_v1 = vmov 0.0   ;;  %v652_v2 = vld [vmem:[%s3043_s5] sm:$0xff]  ;;  %v653_v3 = vld [vmem:[%s3043_s5 + $0x8] sm:$0xff]  ;;  %v654_v4 = vld [vmem:[%s3043_s5 + $0x10] sm:$0xff]  ;;  %v743_v31 = vlaneseq }
  0x8b   : > { %2463 = vsyncadd (%p3103_p3), [#allocation7], 4294966784  ;;  %2163 = vmatprep.subr.bf16.mxu1 %v2497_v0  ;;  %2068 = vmatprep.mubr.msk.f32.mxu1 %vm2498_vm0, %v2499_v1  ;;  %v2164_v5 = vpack.c.bf16 %v653_v3, %v652_v2  ;;  %v655_v6 = vld [vmem:[%s3043_s5 + $0x18] sm:$0xff]  ;;  %v748_v8 = vld [vmem:[%s3041_s3] sm:$0xff]  ;;  %vm663_vm1 = vcmask 261120   ;;  %vm737_vm2 = vcmask 523264  }
  0x8c   : > { %2082 = vmatprep.subr.mxu0 %v2499_v1  ;;  %2084 = vmatprep.mubr.msk.f32.mxu0 %vm2498_vm0, %v2499_v1  ;;  %v2167_v7 = vpack.c.bf16 %v655_v6, %v654_v4  ;;  %v749_v9 = vld [vmem:[%s3041_s3 + $0x8] sm:$0xff]  ;;  %v651_v10 = vld [vmem:[%s580_s17] sm:$0xff]  ;;  %v750_v12 = vld [vmem:[%s3041_s3 + $0x10] sm:$0xff]  ;;  %vm833_vm3 = vcmask 64512   ;;  %s2500_s0 = smov 112   ;;  %s2501_s21 = smov 120  }
  0x8d   : > { %2165 = vmatpush3.bf16.msra.mxu1 %v2164_v5  ;;  %v2170_v11 = vpack.c.bf16 %v749_v9, %v748_v8  ;;  %v751_v13 = vld [vmem:[%s3041_s3 + $0x18] sm:$0xff]  ;;  %v2836_v15 = vld [vmem:[%s571_s28] sm:$0xff]  ;;  %v1985_v16 = vld [vmem:[%s3044_s6] ss:$0 sm:$0xff]  ;;  %s2502_s15 = smov 104   ;;  %p643_p12 = scmp.lt.s32.totalorder %s2482_s27, 1 }
  0x8e   : > { %2166 = vmatprep.subr.bf16.mxu1 %v2497_v0  ;;  %v2173_v14 = vpack.c.bf16 %v751_v13, %v750_v12  ;;  %v1987_v20 = vld [vmem:[%s3042_s4] ss:$0 sm:$0xff]  ;;  %v744_v32 = vshrl.u32 %v743_v31, 7  ;;  %s2503_s23 = smov 96   ;;  %s2504_s20 = smov 80   ;;  %v1510_v31 = vld [vmem:[%s3045_s7 + $0x8] sm:$0xff] }
  0x8f   : > { %s644_s14 = scalar_select %p643_p12, %s2482_s27, 1  ;;  %vm1505_vm4 = vcmask 130048   ;;  %vm1507_vm5 = vcmask 195584  }
  0x90   : > { %v745_v35 = vsub.s32 0, %v744_v32  ;;  %s2505_s19 = smov 72   ;;  %s2506_s1 = smov 88  }
  0x91   : > { %2168 = vmatpush3.bf16.msra.mxu1 %v2167_v7  ;;  %s645_s26 = scalar_lea.vmem %s3040_s2, %s644_s14  ;;  %s2508_s14 = smov 16  }
  0x92   : > { %2169 = vmatprep.subr.bf16.mxu1 %v2497_v0  ;;  %v740_v33 = vld [vmem:[%s645_s26] sm:$0x1]  ;;  %s2509_s13 = smov 24   ;;  %s3105_s12 = sld [smem:[#allocation23_spill]] }
  0x93   : > { %v741_v34 = vmul.f32 -1e+09, %v740_v33  ;;  %v1511_v33 = vld [vmem:[%s3045_s7 + $0x10] sm:$0xff]  ;;  %s3107_s10 = sld [smem:[#allocation26_spill]]  ;;  %s3110_s26 = sld [smem:[#allocation29_spill]] }
  0x94   : > { %2069 = vmatmul.mubr.msk.f32.vlgmr.msra.gmra.mrb[0].mxu1 %vm663_vm1, %v651_v10  ;;  %s2012_s30 = sshll.u32 %s2482_s27, 7  ;;  %s642_s18 = scalar_lea.vmem [#allocation9], %s2780_s9 }
  0x95   : > { %2171 = vmatpush3.bf16.msra.mxu1 %v2170_v11  ;;  %2079 = vmatprep.mubr.msk.f32.mxu1 %vm2498_vm0, %v2499_v1  ;;  %v746_v36 = vrot.slane %v741_v34, %v745_v35  ;;  %v1512_v34 = vld [vmem:[%s3045_s7 + $0x18] sm:$0xff]  ;;  %s1850_s17 = sshll.u32 %s642_s18, 4  ;;  %s2510_s27 = smov [#allocation9]   ;;  %s2990_s17 = int_to_ptr.vmem [resolvable:$true] %s1850_s17 }
  0x96   : > { %2172 = vmatprep.subr.bf16.mxu1 %v2497_v0  ;;  %v2179_v35 = vpack.c.bf16 %v1512_v34, %v1511_v33  ;;  %s2404_s9 = sshll.u32 %s2510_s27, 4  ;;  %s2405_s9 = int_to_ptr.vmem [resolvable:$false] %s2404_s9 }
  0x97   : > { %p2407_p2 = scmp.lt.s32.totalorder %s2990_s17, %s2405_s9 }
  0x99   : > { %2174 = vmatpush3.bf16.msra.mxu1 %v2173_v14 }
  0x9a   : > { %2087 = vmatprep.subr.mxu1 %v2499_v1 }
  0x9c   : > { %2080 = vmatmul.mubr.msk.f32.vlgmr.msra.gmra.mrb[2].mxu1 %vm663_vm1, %v2836_v15 }
  0x9d   : > { %2089 = vmatprep.mubr.msk.f32.mxu1 %vm2498_vm0, %v2499_v1 }
 0x167   : > { %v733_v17 = vpop.f32.mrb[0].mxu1 }
 0x168   : > { %v734_v18 = vadd.f32 %v1985_v16, %v733_v17  ;;  %v2070_v19 = vpop.f32.mrb[1].mxu1 }
 0x16a   : > { %738 = vst.msk [vmem:[#allocation2] sm:$0xff] %vm737_vm2, %v734_v18 }
 0x16f   : > { %v829_v21 = vpop.f32.mrb[2].mxu1 }
 0x170   : > { %v2081_v22 = vpop.f32.mrb[3].mxu1  ;;  %v830_v24 = vadd.f32 %v1987_v20, %v829_v21 }
 0x171   : > { %v2850_v23 = vld [vmem:[#allocation2] sm:$0xff] }
 0x172   : > { %1164 = vrot.lane.b32.xlu1 %v2850_v23, %s2500_s0  ;;  %999 = vrot.lane.b32.xlu0 %v2850_v23, %s2501_s21 }
 0x173   : > { %2083 = vmatpush3.xpose.msk.msra.mxu0 %vm833_vm3, %v2850_v23 }
 0x174   : > { %2092 = vmatprep.subr.mxu0 %v2499_v1 }
 0x176   : > { %2085 = vmatmul.mubr.msk.f32.vlgmr.msra.gmra.mrb[0].mxu0 %vm833_vm3, %v830_v24  ;;  %1162 = vrot.lane.b32.xlu1 %v830_v24, %s2500_s0 }
 0x177   : > { %997 = vrot.lane.b32.xlu0 %v830_v24, %s2501_s21  ;;  %2094 = vmatprep.mubr.msk.f32.mxu0 %vm2498_vm0, %v2499_v1  ;;  %s1836_s21 = scalar_lea.sflag [#allocation5], %s2777_s24 }
 0x17a   : > { %1327 = vrot.lane.b32.xlu1 %v830_v24, %s2502_s15 }
 0x17b   : > { %1329 = vrot.lane.b32.xlu0 %v2850_v23, %s2502_s15  ;;  %s2507_s15 = smov 8  }
 0x1e4   : > { %v1000_v25 = vpop.permute.xlu0 %999  ;;  %v1165_v26 = vpop.permute.xlu1 %1164 }
 0x1e5   : > { %2093 = vmatpush3.xpose.msk.msra.mxu0 %vm833_vm3, %v1000_v25 }
 0x1e6   : > { %2102 = vmatprep.subr.mxu0 %v2499_v1 }
 0x1e8   : > { %v1163_v28 = vpop.permute.xlu1 %1162 }
 0x1e9   : > { %v998_v27 = vpop.permute.xlu0 %997 }
 0x1ea   : > { %2095 = vmatmul.mubr.msk.f32.vlgmr.msra.gmra.mrb[2].mxu0 %vm833_vm3, %v998_v27 }
 0x1eb   : > { %2103 = vmatpush3.xpose.msk.msra.mxu0 %vm833_vm3, %v1165_v26  ;;  %2104 = vmatprep.mubr.msk.f32.mxu0 %vm2498_vm0, %v2499_v1 }
 0x1ec   : > { %2112 = vmatprep.subr.mxu0 %v2499_v1  ;;  %v1328_v30 = vpop.permute.xlu1 %1327 }
 0x1ed   : > { %v1330_v29 = vpop.permute.xlu0 %1329 }
 0x1ee   : > { %2105 = vmatmul.mubr.msk.f32.vlgmr.msra.gmra.mrb[4].mxu0 %vm833_vm3, %v1163_v28 }
 0x1ef   : > { %2113 = vmatpush3.xpose.msk.msra.mxu0 %vm833_vm3, %v1330_v29  ;;  %2114 = vmatprep.mubr.msk.f32.mxu0 %vm2498_vm0, %v2499_v1 }
 0x1f0   : > { %2175 = vmatprep.subr.bf16.mxu0 %v2497_v0 }
 0x1f2   : > { %2115 = vmatmul.mubr.msk.f32.vlgmr.msra.gmra.mrb[6].mxu0 %vm833_vm3, %v1328_v30  ;;  %v1509_v30 = vld [vmem:[%s3045_s7] sm:$0xff] }
 0x1f3   : > { %2130 = vmatprep.mubr.msk.f32.mxu0 %vm2498_vm0, %v2499_v1  ;;  %v2176_v32 = vpack.c.bf16 %v1510_v31, %v1509_v30 }
 0x1f5   : > { %2177 = vmatpush3.bf16.msra.mxu0 %v2176_v32 }
 0x1f6   : > { %2178 = vmatprep.subr.bf16.mxu0 %v2497_v0 }
 0x1f9   : > { %2180 = vmatpush3.bf16.msra.mxu0 %v2179_v35 }
 0x1fa   : > { %2187 = vmatprep.subr.bf16.mxu0 %v2497_v0 }
 0x249   : > { %v906_v37 = vpop.f32.mrb[0].mxu0 }
 0x24a   : > { %v907_v38 = vadd.f32 %v906_v37, %v746_v36  ;;  %v2086_v39 = vpop.f32.mrb[1].mxu0 }
 0x24c   : > { %v910_v40 = vsel %vm833_vm3, %v907_v38, -inf }
 0x24d   : > { %911 = vmax.xlane.f32.xlu0 %v910_v40 }
 0x2bd   : > { %v1071_v41 = vpop.f32.mrb[2].mxu0 }
 0x2be   : > { %v1072_v42 = vadd.f32 %v1071_v41, %v746_v36  ;;  %v2096_v43 = vpop.f32.mrb[3].mxu0 }
 0x2c0   : > { %v1075_v44 = vsel %vm833_vm3, %v1072_v42, -inf }
 0x2c1   : > { %1076 = vmax.xlane.f32.xlu1 %v1075_v44  ;;  %v1236_v45 = vpop.f32.mrb[4].mxu0 }
 0x2c2   : > { %v1237_v46 = vadd.f32 %v1236_v45, %v746_v36  ;;  %v2106_v47 = vpop.f32.mrb[5].mxu0 }
 0x2c4   : > { %v1240_v48 = vsel %vm833_vm3, %v1237_v46, -inf }
 0x2c5   : > { %1241 = vmax.xlane.f32.xlu0 %v1240_v48  ;;  %v1401_v49 = vpop.f32.mrb[6].mxu0  ;;  %v2001_v48 = vld [vmem:[%s3046_s8] ss:$0 sm:$0xff] }
 0x2c6   : > { %v1402_v50 = vadd.f32 %v1401_v49, %v746_v36  ;;  %v2116_v51 = vpop.f32.mrb[7].mxu0 }
 0x2c8   : > { %v1405_v52 = vsel %vm833_vm3, %v1402_v50, -inf }
 0x2c9   : > { %1406 = vmax.xlane.f32.xlu0 %v1405_v52 }
 0x2d2   : > { %921 = vrot.lane.b32.xlu1 %v2850_v23, %s2503_s23 }
 0x2da   : > { %v912_v53 = vpop.xlane.xlu0 %911 }
 0x2db   : > { %v913_v54 = vsub.f32 %v907_v38, %v912_v53 }
 0x2dd   : > { %v914_v55 = vmul.f32 1.442695, %v913_v54 }
 0x2df   : > { %2292 = vpow2.f32 %v914_v55 }
 0x2e9   : > { %v2293_v56 = vpop.eup %2292 }
 0x2ea   : > { %v916_v57 = vsel %vm833_vm3, %v2293_v56, 0.0 }
 0x2f6   : > { %917 = vadd.xlane.f32.xlu1 %v916_v57  ;;  %v1628_v57 = vld [vmem:[#allocation8 + $0x8] sm:$0xff] }
 0x34e   : > { %v1077_v58 = vpop.xlane.xlu1 %1076 }
 0x34f   : > { %v1078_v59 = vsub.f32 %v1072_v42, %v1077_v58 }
 0x351   : > { %v1079_v60 = vmul.f32 1.442695, %v1078_v59  ;;  %v1630_v59 = vld [vmem:[#allocation8 + $0x18] sm:$0xff] }
 0x352   : > { %v922_v61 = vpop.permute.xlu1 %921  ;;  %v1242_v62 = vpop.xlane.xlu0 %1241 }
 0x353   : > { %2294 = vpow2.f32 %v1079_v60  ;;  %v1243_v63 = vsub.f32 %v1237_v46, %v1242_v62  ;;  %2088 = vmatpush3.msra.mxu1 %v922_v61 }
 0x354   : > { %2097 = vmatprep.subr.mxu1 %v2499_v1 }
 0x355   : > { %v1244_v2 = vmul.f32 1.442695, %v1243_v63 }
 0x356   : > { %v1407_v3 = vpop.xlane.xlu0 %1406 }
 0x357   : > { %2296 = vpow2.f32 %v1244_v2  ;;  %v1408_v4 = vsub.f32 %v1402_v50, %v1407_v3 }
 0x359   : > { %v1409_v5 = vmul.f32 1.442695, %v1408_v4 }
 0x35b   : > { %2298 = vpow2.f32 %v1409_v5 }
 0x35d   : > { %v2295_v6 = vpop.eup %2294 }
 0x35e   : > { %v1081_v7 = vsel %vm833_vm3, %v2295_v6, 0.0 }
 0x35f   : > { %1082 = vadd.xlane.f32.xlu0 %v1081_v7 }
 0x361   : > { %v2297_v8 = vpop.eup %2296 }
 0x362   : > { %v1246_v9 = vsel %vm833_vm3, %v2297_v8, 0.0 }
 0x363   : > { %1247 = vadd.xlane.f32.xlu1 %v1246_v9 }
 0x365   : > { %v2299_v10 = vpop.eup %2298 }
 0x366   : > { %v1411_v11 = vsel %vm833_vm3, %v2299_v10, 0.0 }
 0x367   : > { %1412 = vadd.xlane.f32.xlu0 %v1411_v11 }
 0x374   : > { %1251 = vrot.lane.b32.xlu1 %v2850_v23, %s2504_s20  ;;  %s3106_s20 = sld [smem:[#allocation24_spill]] }
 0x378   : > { %1416 = vrot.lane.b32.xlu1 %v2850_v23, %s2505_s19  ;;  %s3104_s19 = sld [smem:[#allocation27_spill]] }
 0x37d   : > { %1086 = vrot.lane.b32.xlu0 %v2850_v23, %s2506_s1  ;;  %s3111_s1 = sld [smem:[#allocation30_spill]] }
 0x37e   : > { %v1713_v61 = vld [vmem:[%s3104_s19 + $0x8] sm:$0xff]  ;;  %v1714_v62 = vld [vmem:[%s3104_s19 + $0x10] sm:$0xff]  ;;  %v1715_v2 = vld [vmem:[%s3104_s19 + $0x18] sm:$0xff] }
 0x37f   : > { %v2191_v3 = vpack.c.bf16 %v1715_v2, %v1714_v62  ;;  %v1716_v4 = vld [vmem:[%s3104_s19 + $0x20] sm:$0xff]  ;;  %v1717_v5 = vld [vmem:[%s3104_s19 + $0x28] sm:$0xff] }
 0x383   : > { %v918_v12 = vpop.xlane.xlu1 %917 }
 0x384   : > { %2300 = vrcp.f32 %v918_v12 }
 0x38e   : > { %v2301_v13 = vpop.eup %2300 }
 0x38f   : > { %v920_v14 = vmul.f32 %v2301_v13, %v2293_v56  ;;  %v1627_v56 = vld [vmem:[#allocation8] sm:$0xff] }
 0x390   : > { %v2182_v58 = vpack.c.bf16 %v1628_v57, %v1627_v56 }
 0x391   : > { %2090 = vmatmul.mubr.msk.f32.vlgmr.msra.gmra.mrb[4].mxu1 %vm833_vm3, %v920_v14 }
 0x392   : > { %2099 = vmatprep.mubr.msk.f32.mxu1 %vm2498_vm0, %v2499_v1 }
 0x3ec   : > { %v1083_v16 = vpop.xlane.xlu0 %1082 }
 0x3ed   : > { %2302 = vrcp.f32 %v1083_v16 }
 0x3f0   : > { %v1248_v17 = vpop.xlane.xlu1 %1247 }
 0x3f1   : > { %2304 = vrcp.f32 %v1248_v17 }
 0x3f4   : > { %v1413_v18 = vpop.xlane.xlu0 %1412  ;;  %v1252_v21 = vpop.permute.xlu1 %1251 }
 0x3f5   : > { %2306 = vrcp.f32 %v1413_v18  ;;  %v2003_v18 = vld [vmem:[%s3105_s12] ss:$0 sm:$0xff] }
 0x3f7   : > { %v2303_v19 = vpop.eup %2302 }
 0x3f8   : > { %v1085_v20 = vmul.f32 %v2303_v19, %v2295_v6  ;;  %v1087_v22 = vpop.permute.xlu0 %1086  ;;  %v1417_v25 = vpop.permute.xlu1 %1416  ;;  %v2194_v6 = vpack.c.bf16 %v1717_v5, %v1716_v4 }
 0x3f9   : > { %2098 = vmatpush3.msra.mxu1 %v1087_v22  ;;  %v1718_v22 = vld [vmem:[%s3104_s19 + $0x30] sm:$0xff] }
 0x3fa   : > { %2100 = vmatmul.mubr.msk.f32.vlgmr.msra.gmra.mrb[6].mxu1 %vm833_vm3, %v1085_v20  ;;  %2107 = vmatprep.subr.mxu1 %v2499_v1 }
 0x3fb   : > { %v2305_v23 = vpop.eup %2304  ;;  %2108 = vmatpush3.msra.mxu1 %v1252_v21  ;;  %2109 = vmatprep.mubr.msk.f32.mxu1 %vm2498_vm0, %v2499_v1 }
 0x3fc   : > { %v1250_v24 = vmul.f32 %v2305_v23, %v2297_v8  ;;  %2117 = vmatprep.subr.mxu1 %v2499_v1  ;;  %v1719_v23 = vld [vmem:[%s3104_s19 + $0x38] sm:$0xff] }
 0x3fe   : > { %2110 = vmatmul.mubr.msk.f32.vlgmr.msra.gmra.mrb[8].mxu1 %vm833_vm3, %v1250_v24  ;;  %v2197_v24 = vpack.c.bf16 %v1719_v23, %v1718_v22 }
 0x3ff   : > { %v2307_v26 = vpop.eup %2306  ;;  %2118 = vmatpush3.msra.mxu1 %v1417_v25  ;;  %2119 = vmatprep.mubr.msk.f32.mxu1 %vm2498_vm0, %v2499_v1  ;;  %v2005_v25 = vld [vmem:[%s3107_s10] ss:$0 sm:$0xff]  ;;  %s3112_s10 = sld [smem:[#allocation31_spill]] }
 0x400   : > { %v1415_v27 = vmul.f32 %v2307_v26, %v2299_v10  ;;  %2181 = vmatprep.subr.bf16.mxu1 %v2497_v0 }
 0x402   : > { %2120 = vmatmul.mubr.msk.f32.vlgmr.msra.gmra.mrb[10].mxu1 %vm833_vm3, %v1415_v27 }
 0x403   : > { %2141 = vmatprep.mubr.msk.f32.mxu1 %vm2498_vm0, %v2499_v1  ;;  %2183 = vmatpush3.bf16.msra.mxu1 %v2182_v58 }
 0x404   : > { %2184 = vmatprep.subr.bf16.mxu1 %v2497_v0 }
 0x405   : > { %s2988_s0 = scalar_lea.hbm %s3112_s10, %s2012_s30 }
 0x464   : > { %v993_v28 = vpop.f32.mrb[4].mxu1 }
 0x465   : > { %v2091_v29 = vpop.f32.mrb[5].mxu1 }
 0x4cd   : > { %v1158_v36 = vpop.f32.mrb[6].mxu1 }
 0x4ce   : > { %1493 = vrot.lane.b32.xlu0 %v1158_v36, %s2507_s15  ;;  %v2101_v37 = vpop.f32.mrb[7].mxu1  ;;  %s3108_s15 = sld [smem:[#allocation28_spill]] }
 0x4d1   : > { %v1323_v38 = vpop.f32.mrb[8].mxu1 }
 0x4d2   : > { %1497 = vrot.lane.b32.xlu1 %v1323_v38, %s2508_s14  ;;  %v2111_v39 = vpop.f32.mrb[9].mxu1  ;;  %s3109_s14 = sld [smem:[#allocation19_spill]] }
 0x4d4   : > { %v2007_v30 = vld [vmem:[%s3108_s15] ss:$0 sm:$0xff]  ;;  %s2400_s15 = scalar_lea.vmem %s2990_s17, 128 }
 0x4d5   : > { %v1488_v40 = vpop.f32.mrb[10].mxu1  ;;  %p2401_p0 = scmp.ne.s32.totalorder %s2990_s17, %s2400_s15 }
 0x4d6   : > { %1501 = vrot.lane.b32.xlu0 %v1488_v40, %s2509_s13  ;;  %v2121_v41 = vpop.f32.mrb[11].mxu1  ;;  %s2406_s13 = scalar_lea.vmem %s2405_s9, 256 }
 0x4d7   : > { %p2408_p7 = scmp.lt.s32.totalorder %s2406_s13, %s2400_s15 }
 0x4d8   : > { %p3113_p5 = scmp.ne.s32.totalorder %s3109_s14, 0 }
 0x4d9   : > { %p2409_p4 = por %p2408_p7, %p2407_p2 }
 0x4da   : > { %p2402_p9 = pnand %p2401_p0, %p3113_p5 }
 0x4dc   : > { %p2403_p1 = pneg %p2402_p9 }
 0x4de   : > { %p2410_p8 = pnand %p2409_p4, %p2403_p1 }
 0x540   : > { %v1494_v42 = vpop.permute.xlu0 %1493 }
 0x541   : > { %v1504_v44 = vsel %vm833_vm3, %v993_v28, %v1494_v42 }
 0x544   : > { %v1498_v43 = vpop.permute.xlu1 %1497 }
 0x545   : > { %v1506_v45 = vsel %vm1505_vm4, %v1504_v44, %v1498_v43 }
 0x548   : > { %v1502_v46 = vpop.permute.xlu0 %1501 }
 0x549   : > { %v1508_v47 = vsel %vm1507_vm5, %v1506_v45, %v1502_v46 }
 0x54a   : > { %2131 = vmatmul.mubr.msk.f32.vlgmr.msra.gmra.mrb[8].mxu0 %vm663_vm1, %v1508_v47 }
 0x54b   : > { %2160 = vmatprep.mubr.msk.f32.mxu0 %vm2498_vm0, %v2499_v1  ;;  %v1629_v1 = vld [vmem:[#allocation8 + $0x10] sm:$0xff] }
 0x54c   : > { %v2185_v60 = vpack.c.bf16 %v1630_v59, %v1629_v1 }
 0x54e   : > { %2186 = vmatpush3.bf16.msra.mxu1 %v2185_v60 }
 0x61d   : > { %v1589_v49 = vpop.f32.mrb[8].mxu0 }
 0x61e   : > { %v1590_v50 = vadd.f32 %v2001_v48, %v1589_v49  ;;  %v2132_v51 = vpop.f32.mrb[9].mxu0  ;;  %v2009_v48 = vld [vmem:[%s3110_s26] ss:$0 sm:$0xff] }
 0x620   : > { %v1593_v52 = vadd.f32 %v1590_v50, %v2836_v15  ;;  %v1712_v15 = vld [vmem:[%s3104_s19] sm:$0xff] }
 0x621   : > { %v2188_v63 = vpack.c.bf16 %v1713_v61, %v1712_v15  ;;  %v2010_v50 = vld [vmem:[%s3111_s1] ss:$0 sm:$0xff] }
 0x622   : > { %v1596_v53 = vsel %vm663_vm1, %v1593_v52, 0.0  ;;  %v1601_v54 = vmul.f32 %v1593_v52, %v1593_v52 }
 0x623   : > { %1597 = vadd.xlane.f32.xlu1 %v1596_v53  ;;  %2189 = vmatpush3.bf16.msra.mxu0 %v2188_v63 }
 0x624   : > { %v1602_v55 = vsel %vm663_vm1, %v1601_v54, 0.0  ;;  %2190 = vmatprep.subr.bf16.mxu0 %v2497_v0 }
 0x625   : > { %1603 = vadd.xlane.f32.xlu0 %v1602_v55 }
 0x627   : > { %2192 = vmatpush3.bf16.msra.mxu0 %v2191_v3 }
 0x628   : > { %2193 = vmatprep.subr.bf16.mxu0 %v2497_v0 }
 0x62b   : > { %2195 = vmatpush3.bf16.msra.mxu0 %v2194_v6 }
 0x62c   : > { %2196 = vmatprep.subr.bf16.mxu0 %v2497_v0  ;;  %v2004_v0 = vld [vmem:[%s3106_s20] ss:$0 sm:$0xff] }
 0x62f   : > { %2198 = vmatpush3.bf16.msra.mxu0 %v2197_v24 }
 0x6b0   : > { %v1598_v7 = vpop.xlane.xlu1 %1597 }
 0x6b1   : > { %v1600_v8 = vmul.f32 0.03125, %v1598_v7 }
 0x6b2   : > { %v1604_v9 = vpop.xlane.xlu0 %1603 }
 0x6b3   : > { %v1606_v10 = vmul.f32 %v1600_v8, %v1600_v8  ;;  %v1605_v11 = vmul.f32 0.03125, %v1604_v9  ;;  %v1609_v16 = vsub.f32 %v1593_v52, %v1600_v8 }
 0x6b5   : > { %v1607_v12 = vsub.f32 %v1605_v11, %v1606_v10 }
 0x6b7   : > { %v1608_v13 = vmax.f32 %v1607_v12, 0.0 }
 0x6b9   : > { %v1610_v14 = vadd.f32 1e-06, %v1608_v13 }
 0x6bb   : > { %2308 = vrsqrt.f32 %v1610_v14 }
 0x6c5   : > { %v2309_v17 = vpop.eup %2308 }
 0x6c6   : > { %v1612_v19 = vmul.f32 %v2309_v17, %v1609_v16 }
 0x6c8   : > { %v1619_v20 = vmul.f32 %v2003_v18, %v1612_v19 }
 0x6ca   : > { %v1626_v21 = vadd.f32 %v2004_v0, %v1619_v20 }
 0x6cc   : > { %2142 = vmatmul.mubr.msk.f32.vlgmr.msra.gmra.mrb[12].mxu1 %vm663_vm1, %v1626_v21 }
 0x79f   : > { %v1707_v26 = vpop.f32.mrb[12].mxu1 }
 0x7a0   : > { %v1708_v27 = vadd.f32 %v2005_v25, %v1707_v26  ;;  %v2143_v28 = vpop.f32.mrb[13].mxu1 }
 0x7a2   : > { %v1711_v29 = vmax.f32 %v1708_v27, 0.0 }
 0x7a4   : > { %2161 = vmatmul.mubr.msk.f32.vlgmr.msra.gmra.mrb[10].mxu0 %vm737_vm2, %v1711_v29 }
 0x877   : > { %v1797_v31 = vpop.f32.mrb[10].mxu0 }
 0x878   : > { %v1798_v32 = vadd.f32 %v2007_v30, %v1797_v31  ;;  %v2162_v33 = vpop.f32.mrb[11].mxu0 }
 0x87a   : > { %v1801_v34 = vadd.f32 %v1798_v32, %v1626_v21 }
 0x87c   : > { %v1804_v35 = vsel %vm663_vm1, %v1801_v34, 0.0  ;;  %v1808_v36 = vmul.f32 %v1801_v34, %v1801_v34 }
 0x87d   : > { %1805 = vadd.xlane.f32.xlu0 %v1804_v35 }
 0x87e   : > { %v1809_v37 = vsel %vm663_vm1, %v1808_v36, 0.0 }
 0x87f   : > { %1810 = vadd.xlane.f32.xlu1 %v1809_v37 }
 0x90a   : > { %v1806_v38 = vpop.xlane.xlu0 %1805 }
 0x90b   : > { %v1807_v39 = vmul.f32 0.03125, %v1806_v38 }
 0x90c   : > { %v1811_v40 = vpop.xlane.xlu1 %1810 }
 0x90d   : > { %v1813_v41 = vmul.f32 %v1807_v39, %v1807_v39  ;;  %v1812_v42 = vmul.f32 0.03125, %v1811_v40  ;;  %v1816_v46 = vsub.f32 %v1801_v34, %v1807_v39 }
 0x90f   : > { %v1814_v43 = vsub.f32 %v1812_v42, %v1813_v41 }
 0x911   : > { %v1815_v44 = vmax.f32 %v1814_v43, 0.0 }
 0x913   : > { %v1817_v45 = vadd.f32 1e-06, %v1815_v44 }
 0x915   : > { %2310 = vrsqrt.f32 %v1817_v45 }
 0x91f   : > { %v2311_v47 = vpop.eup %2310 }
 0x920   : > { %v1819_v49 = vmul.f32 %v2311_v47, %v1816_v46 }
 0x922   : > { %v1826_v51 = vmul.f32 %v2009_v48, %v1819_v49 }
 0x924   : > { %v1833_v52 = vadd.f32 %v2010_v50, %v1826_v51 }
 0x926   : > { %1834 = vst.msk [vmem:[%s642_s18] sm:$0xff] %vm663_vm1, %v1833_v52 }
 0x927   : > { %2413 = shalt.err (!%p2410_p8)
}
 0x928   : > { %s2414_s24 = scalar_lea.hbm %s2988_s0, 128  ;;  %s2418_s23 = scalar_lea.hbm %s3112_s10, 256 }
 0x929   : > { %p2415_p11 = scmp.ne.s32.totalorder %s2988_s0, %s2414_s24  ;;  %p2419_p13 = scmp.lt.u32.totalorder %s2988_s0, %s3112_s10 }
 0x92a   : > { %p2420_p3 = scmp.lt.u32.totalorder %s2418_s23, %s2414_s24  ;;  %p2422_p0 = scmp.lt.u32.totalorder %s2414_s24, %s2988_s0 }
 0x92b   : > { %p2416_p6 = pnand %p2415_p11, %p3113_p5 }
 0x92c   : > { %p2421_p12 = por %p2420_p3, %p2419_p13 }
 0x92d   : > { %p2417_p10 = pneg %p2416_p6 }
 0x92e   : > { %p2423_p9 = por %p2422_p0, %p2421_p12 }
 0x930   : > { %p2424_p1 = pnand %p2423_p9, %p2417_p10 }
 0x932   : > { %2427 = shalt.err (!%p2424_p1)
}
 0x933   : > { %2207 = dma.vmem_to_hbm [thread:$0]  (%p3113_p5), %s2990_s17, 128, %s2988_s0, %s1836_s21  }
 0x934 PF: > { %s3114_s30 = sld [smem:[#allocation14_spill]]  ;;  %s3115_s18 = sld [smem:[#allocation17_spill]] }
 0x935   : > { %p3117_p7 = scmp.ge.s32.totalorder %s2490_s29, 2 }
 0x93a   : > { %s1862_s22 = sand.u32 1, %s3114_s30   ;;  %p3116_p2 = scmp.ne.s32.totalorder %s3115_s18, 0 }
 0x93b   : > { %s1863_s28 = scalar_lea.sflag [#allocation5], %s1862_s22 }
 0x93c   : > { %p2221_p4 = pnand %p3117_p7, %p3116_p2 }
 0x93e   : > { %2465 = dma.done.wait (!%p2221_p4), %s1863_s28, 128  }
 0x93f   : > { %2467 = vsyncadd (!%p2221_p4), %s1863_s28, 4294967168  ;;  %s36_s29 = sadd.s32 1, %s2490_s29   ;;  %s3118_s15 = sld [smem:[#allocation15_spill]] }
 0x940   : > { %p33_p8 = scmp.ge.s32.totalorder %s36_s29, 4   ;;  %s3119_s26 = sld [smem:[#allocation20_spill]] }
 0x941   : > { %s3120_s27 = sld [smem:[#allocation16_spill]]  ;;  %s3121_s28 = sld [smem:[#allocation18_spill]] }
 0x942   : > { %s3122_s24 = smov %s2474_s25  ;;  %35 = sbr.rel (!%p33_p8) target bundleno = 20 (0x14), region = 157 }
 0x945   : > { %s3123_s25 = smov %s3118_s15 }
 0x949   :  { %1868 = vsyncpa [#allocation4], 1 }
 0x94a   :  { %1870 = vsyncpa [#allocation4 + $0x1], 1 }
 0x94b   :  { %1871 = vsyncpa [#allocation7], 1 }
 0x94c   :  { %1873 = vsyncpa [#allocation7 + $0x1], 1 }
 0x94d   :  { %1874 = vsyncpa [#allocation5], 1 }
 0x94e   :  { %1876 = vsyncpa [#allocation5 + $0x1], 1 }

</bundles_post_ra>
